<compile_context>
chip_gen: v5e
topology: v5e:2x2
jax: 0.10.0
libtpu: 0.0.40
codegen_flags: <defaults>
</compile_context>

<pallas_src>
import functools

import numpy as np
import jax
import jax.numpy as jnp
from jax.experimental import pallas as pl
from jax.experimental.pallas import tpu as pltpu


def _pick_tile(P, max_tile=1024):
    """Largest multiple of 128 that divides P and is <= max_tile."""
    assert P % 128 == 0, "H*W must be a multiple of 128"
    for cand in range(max_tile, 0, -128):
        if cand <= P and P % cand == 0:
            return cand
    return 128


# --------------------------------------------------------------------------
# plain-JAX mesh helpers (gather / scatter-add glue, match DECA util.py)
# --------------------------------------------------------------------------
def face_vertices(vertices, faces):
    """vertices: (bs, nv, C), faces: (bs, nf, 3) int -> (bs, nf, 3, C)."""
    bs, nv = vertices.shape[:2]
    faces_g = faces + (jnp.arange(bs, dtype=faces.dtype) * nv)[:, None, None]
    flat = vertices.reshape(bs * nv, vertices.shape[-1])
    return flat[faces_g]


def vertex_normals(vertices, faces):
    """vertices: (bs, nv, 3), faces: (bs, nf, 3) int -> (bs, nv, 3)."""
    bs, nv = vertices.shape[:2]
    faces_g = faces + (jnp.arange(bs, dtype=faces.dtype) * nv)[:, None, None]
    fflat = faces_g.reshape(-1, 3)
    vflat = vertices.reshape(bs * nv, 3).astype(jnp.float32)
    vf = vflat[fflat]  # (bs*nf, 3, 3)
    normals = jnp.zeros((bs * nv, 3), jnp.float32)
    normals = normals.at[fflat[:, 1]].add(
        jnp.cross(vf[:, 2] - vf[:, 1], vf[:, 0] - vf[:, 1]))
    normals = normals.at[fflat[:, 2]].add(
        jnp.cross(vf[:, 0] - vf[:, 2], vf[:, 1] - vf[:, 2]))
    normals = normals.at[fflat[:, 0]].add(
        jnp.cross(vf[:, 1] - vf[:, 0], vf[:, 2] - vf[:, 0]))
    norm = jnp.linalg.norm(normals, axis=1, keepdims=True)
    normals = normals / jnp.maximum(norm, 1e-6)  # F.normalize(eps=1e-6)
    return normals.reshape(bs, nv, 3)


# --------------------------------------------------------------------------
# fused Pallas kernel: rasterize + interp + SH shading + grid_sample + compose
# --------------------------------------------------------------------------
def _render_kernel(fvs_ref, attr_ref, coef_ref, tex_ref, out_ref,
                   *, H, W, Huv, Wuv, F, TILE, use_sh):
    # fvs_ref  : SMEM (N, F*9)      screen-space face corners (x,y,z) * 3
    # attr_ref : VMEM (1, 3, 6, F)  per-corner attr tables [u, v, tnz, nx, ny, nz]
    # coef_ref : SMEM (N, 27)       SH coeffs pre-scaled by constant_factor
    # tex_ref  : VMEM (1, 3, Huv, Wuv) albedo texture (stays resident over tiles)
    # out_ref  : VMEM (1, 13, TILE) coalesced lane-dense output tile
    b = pl.program_id(0)
    t = pl.program_id(1)
    eps = 1e-8

    # ----- pixel NDC coords, lane-dense (1, TILE) ---------------------------
    lane = jax.lax.broadcasted_iota(jnp.int32, (1, TILE), 1)
    li = t * TILE + lane                                  # flat row-major pixel id
    if (W & (W - 1)) == 0:                                # integer path (cheap VPU)
        shift = W.bit_length() - 1
        yi = (li >> shift).astype(jnp.float32)
        xi = (li & (W - 1)).astype(jnp.float32)
    else:
        pf = li.astype(jnp.float32)
        yi = jnp.floor(pf / W)
        xi = pf - yi * W
    # pytorch3d NDC convention for square images (+X left, +Y up)
    yf = (2.0 * (H - 1.0 - yi) + 1.0) / H - 1.0
    xf = (2.0 * (W - 1.0 - xi) + 1.0) / W - 1.0

    zero = jnp.zeros((1, TILE), jnp.float32)

    # ----- brute-force z-buffer over faces (deferred attribute interp) ------
    init = (jnp.full((1, TILE), jnp.inf, jnp.float32),    # best z
            zero, zero, zero,                             # winning barycentrics
            jnp.zeros((1, TILE), jnp.int32))              # winning face id

    def face_body(f, carry):
        best_z, bw0, bw1, bw2, best_f = carry
        o = f * 9
        v0x = fvs_ref[b, o + 0]; v0y = fvs_ref[b, o + 1]; v0z = fvs_ref[b, o + 2]
        v1x = fvs_ref[b, o + 3]; v1y = fvs_ref[b, o + 4]; v1z = fvs_ref[b, o + 5]
        v2x = fvs_ref[b, o + 6]; v2y = fvs_ref[b, o + 7]; v2z = fvs_ref[b, o + 8]

        # 2x signed triangle area; sign-preserving epsilon (no blow-up at -eps)
        area = (v2x - v0x) * (v1y - v0y) - (v2y - v0y) * (v1x - v0x)
        inv_area = 1.0 / jnp.where(area >= 0.0, area + eps, area - eps)

        w0 = ((xf - v1x) * (v2y - v1y) - (yf - v1y) * (v2x - v1x)) * inv_area
        w1 = ((xf - v2x) * (v0y - v2y) - (yf - v2y) * (v0x - v2x)) * inv_area
        w2 = ((xf - v0x) * (v1y - v0y) - (yf - v0y) * (v1x - v0x)) * inv_area
        pz = w0 * v0z + w1 * v1z + w2 * v2z

        # normalized barycentrics are winding-invariant -> no backface cull
        inside = (w0 > 0.0) & (w1 > 0.0) & (w2 > 0.0)
        valid = inside & (pz >= 0.0) & (jnp.abs(area) > eps)
        update = valid & (pz < best_z)

        best_z = jnp.where(update, pz, best_z)
        bw0 = jnp.where(update, w0, bw0)
        bw1 = jnp.where(update, w1, bw1)
        bw2 = jnp.where(update, w2, bw2)
        best_f = jnp.where(update, f, best_f)
        return best_z, bw0, bw1, bw2, best_f

    best_z, bw0, bw1, bw2, best_f = jax.lax.fori_loop(
        0, F, face_body, init, unroll=True)   # F tiny & static -> unrolled
    # TODO(synk): production F~10k -> unroll=False + face chunking via grid axis.

    vis = best_z < jnp.inf                                # (1, TILE)
    alpha = vis.astype(jnp.float32)

    # ----- fetch winning face attrs: one-hot(F,TILE) x (6,F) on the MXU -----
    fid = jax.lax.broadcasted_iota(jnp.int32, (F, TILE), 0)
    onehot_f = (fid == best_f).astype(jnp.float32)        # (F, TILE)
    # bw* are zero for invisible pixels, so interp is already zero there.
    interp = (bw0 * jnp.dot(attr_ref[0, 0], onehot_f, preferred_element_type=jnp.float32)
              + bw1 * jnp.dot(attr_ref[0, 1], onehot_f, preferred_element_type=jnp.float32)
              + bw2 * jnp.dot(attr_ref[0, 2], onehot_f, preferred_element_type=jnp.float32))
    # interp: (6, TILE) = [u, v, transformed-normal z, normal x, y, z]
    u = interp[0:1, :]
    v = interp[1:2, :]
    tnz = interp[2:3, :]
    nx = interp[3:4, :]
    ny = interp[4:5, :]
    nz = interp[5:6, :]

    pos_mask = (tnz < -0.05).astype(jnp.float32)

    # ----- SH shading (add_SHlight) ------------------------------------------
    if use_sh:
        ones = jnp.ones((1, TILE), jnp.float32)
        basis = (ones, nx, ny, nz, nx * ny, nx * nz, ny * nz,
                 nx * nx - ny * ny, 3.0 * nz * nz - 1.0)
        shading = []
        for c in range(3):
            s = zero
            for k in range(9):
                s = s + basis[k] * coef_ref[b, k * 3 + c]
            shading.append(s)                              # (1, TILE) each
    else:
        shading = [zero, zero, zero]

    # ----- separable bilinear grid_sample (align_corners=False, zeros pad) ---
    ix = ((u + 1.0) * Wuv - 1.0) * 0.5
    iy = ((v + 1.0) * Huv - 1.0) * 0.5
    ix0 = jnp.floor(ix); iy0 = jnp.floor(iy)
    wx1 = ix - ix0; wx0 = 1.0 - wx1
    wy1 = iy - iy0; wy0 = 1.0 - wy1
    ix0i = ix0.astype(jnp.int32); ix1i = ix0i + 1
    iy0i = iy0.astype(jnp.int32); iy1i = iy0i + 1

    wid = jax.lax.broadcasted_iota(jnp.int32, (Wuv, TILE), 0)
    hid = jax.lax.broadcasted_iota(jnp.int32, (Huv, TILE), 0)
    # out-of-range taps never match any row -> implicit zeros padding
    ox = ((wid == ix0i).astype(jnp.float32) * wx0
          + (wid == ix1i).astype(jnp.float32) * wx1)       # (Wuv, TILE)
    oy = ((hid == iy0i).astype(jnp.float32) * wy0
          + (hid == iy1i).astype(jnp.float32) * wy1)       # (Huv, TILE)

    # NOTE: cast ox/oy + tex to bf16 on v6e/v7x for ~3-4x MXU throughput if the
    # small bilinear-weight precision loss is acceptable.
    albedo = []
    for c in range(3):
        txp = jnp.dot(tex_ref[0, c], ox,
                      preferred_element_type=jnp.float32)  # (Huv, TILE)
        albedo.append(jnp.sum(txp * oy, axis=0, keepdims=True))  # XLU reduce

    # ----- compose + single coalesced lane-dense store ----------------------
    rows = []
    for c in range(3):
        if use_sh:
            rows.append(albedo[c] * shading[c] * alpha)
        else:
            rows.append(albedo[c] * alpha)
    rows += albedo + shading + [alpha, pos_mask, u, v]      # 13 rows total
    out_ref[0] = jnp.concatenate(rows, axis=0)              # (13, TILE)


def pallas_render(fvs, attr_tab, coef, tex, image_size, uv_size, use_sh):
    """Fused rasterize + shade + sample + compose.

    fvs      : (N, F*9)  f32 screen-space face corners
    attr_tab : (N, 3, 6, F) f32 per-corner attribute tables
    coef     : (N, 27) f32 pre-scaled SH coefficients
    tex      : (N, 3, Huv, Wuv) f32 albedo texture
    returns  : (N, 13, P) f32:
               [images(3) | albedo(3) | shading(3) | alpha | pos_mask | u | v]
    """
    N = fvs.shape[0]
    F = fvs.shape[1] // 9
    H = W = image_size
    P = H * W
    tile = _pick_tile(P)
    n_tiles = P // tile

    kernel = functools.partial(_render_kernel, H=H, W=W, Huv=uv_size,
                               Wuv=uv_size, F=F, TILE=tile, use_sh=use_sh)

    smem = pl.BlockSpec(memory_space=pltpu.MemorySpace.SMEM)

    return pl.pallas_call(
        kernel,
        out_shape=jax.ShapeDtypeStruct((N, 13, P), jnp.float32),
        grid=(N, n_tiles),
        in_specs=[
            smem,                                                  # fvs
            # attr/tex block indices depend only on b -> VMEM-resident across
            # pixel tiles (single small DMA per batch element).
            pl.BlockSpec((1, 3, 6, F), lambda b, t: (b, 0, 0, 0)),  # attr_tab
            smem,                                                  # coef
            pl.BlockSpec((1, 3, uv_size, uv_size),
                         lambda b, t: (b, 0, 0, 0)),               # tex
        ],
        out_specs=pl.BlockSpec((1, 13, tile), lambda b, t: (b, 0, t)),
        compiler_params=pltpu.CompilerParams(
            dimension_semantics=("parallel", "parallel"),
            vmem_limit_bytes=32 * 1024 * 1024),
    )(fvs, attr_tab, coef, tex)


# --------------------------------------------------------------------------
# Renderer (JAX port; synthetic mesh instead of load_obj)
# --------------------------------------------------------------------------
class Renderer:
    def __init__(self, image_size=16, uv_size=16):
        self.image_size = image_size
        self.uv_size = uv_size
        # synthetic deterministic mesh in lieu of load_obj(obj_filename):
        # 8 vertices, 4 triangles; uv topology identical to vertex topology.
        faces = jnp.array([[0, 1, 2], [2, 3, 0], [4, 5, 6], [6, 7, 4]],
                          dtype=jnp.int32)[None]                    # (1, F, 3)
        uvfaces = faces
        uvcoords = jnp.array(
            [[0.10, 0.10], [0.90, 0.10], [0.90, 0.90], [0.10, 0.90],
             [0.25, 0.30], [0.75, 0.30], [0.75, 0.80], [0.25, 0.80]],
            dtype=jnp.float32)[None]                                # (1, Vt, 2)
        self.faces = faces
        self.raw_uvcoords = uvcoords
        uvc = jnp.concatenate([uvcoords, uvcoords[:, :, 0:1] * 0.0 + 1.0], -1)
        uvc = uvc * 2.0 - 1.0
        uvc = uvc.at[..., 1].multiply(-1.0)
        self.uvcoords = uvc
        self.uvfaces = uvfaces
        self.face_uvcoords = face_vertices(uvc, uvfaces)            # (1, F, 3, 3)
        nverts = int(faces.max()) + 1
        colors = jnp.tile(jnp.array([74.0, 120.0, 168.0],
                                    jnp.float32)[None, None, :],
                          (1, nverts, 1)) / 255.0
        self.face_colors = face_vertices(colors, faces)
        pi = np.pi
        self.constant_factor = jnp.array(
            [1 / np.sqrt(4 * pi),
             2 * pi / 3 * np.sqrt(3 / (4 * pi)),
             2 * pi / 3 * np.sqrt(3 / (4 * pi)),
             2 * pi / 3 * np.sqrt(3 / (4 * pi)),
             pi / 4 * 3 * np.sqrt(5 / (12 * pi)),
             pi / 4 * 3 * np.sqrt(5 / (12 * pi)),
             pi / 4 * 3 * np.sqrt(5 / (12 * pi)),
             pi / 4 * (3 / 2) * np.sqrt(5 / (12 * pi)),
             pi / 4 * (1 / 2) * np.sqrt(5 / (4 * pi))], dtype=jnp.float32)

    def __call__(self, vertices, transformed_vertices, albedos, lights=None,
                 light_type='point'):
        N = vertices.shape[0]
        H = W = self.image_size
        F = self.faces.shape[1]
        faces = jnp.broadcast_to(self.faces, (N,) + self.faces.shape[1:])

        normals = vertex_normals(vertices, faces)
        face_normals = face_vertices(normals, faces)
        transformed_normals = vertex_normals(transformed_vertices, faces)
        transformed_face_normals = face_vertices(transformed_normals, faces)
        face_uv = jnp.broadcast_to(self.face_uvcoords,
                                   (N,) + self.face_uvcoords.shape[1:])

        # Only the 6 attribute channels the SH forward path consumes:
        # [u, v, transformed-normal z, normal x, normal y, normal z]
        attr6 = jnp.concatenate(
            [face_uv[..., 0:2], transformed_face_normals[..., 2:3],
             face_normals], axis=-1)                              # (N, F, 3, 6)
        # per-corner tables, faces on the lane axis: (N, 3, 6, F)
        attr_tab = jnp.transpose(attr6, (0, 2, 3, 1)).astype(jnp.float32)

        # screen-space face corner coords with the pytorch3d x/y flip
        fixed = transformed_vertices.at[..., :2].multiply(-1.0)
        face_verts = face_vertices(fixed.astype(jnp.float32), faces)
        fvs = face_verts.reshape(N, -1).astype(jnp.float32)        # (N, F*9)

        use_sh = lights is not None and lights.shape[1] == 9
        if use_sh:
            coef = (lights.astype(jnp.float32) *
                    self.constant_factor[None, :, None]).reshape(N, 27)
        else:
            coef = jnp.zeros((N, 27), jnp.float32)
            # TODO(synk): point/directional light branches not exercised here.

        tex = albedos.astype(jnp.float32)                          # (N, 3, Huv, Wuv)

        out = pallas_render(fvs, attr_tab, coef, tex,
                            self.image_size, self.uv_size, use_sh)  # (N, 13, P)

        images = out[:, 0:3].reshape(N, 3, H, W)
        albedo_images = out[:, 3:6].reshape(N, 3, H, W)
        shading_images = out[:, 6:9].reshape(N, 3, H, W)
        alpha_images = out[:, 9:10].reshape(N, 1, H, W)
        pos_mask = out[:, 10:11].reshape(N, 1, H, W)
        grid = jnp.transpose(out[:, 11:13], (0, 2, 1)).reshape(N, H, W, 2)
        return {
            'images': images,
            'albedo_images': albedo_images,
            'alpha_images': alpha_images,
            'pos_mask': pos_mask,
            'shading_images': shading_images,
            'grid': grid,
            'normals': normals,
        }


if __name__ == "__main__":
    key = jax.random.PRNGKey(0)
    N, V = 2, 8
    image_size, uv_size = 16, 16
    renderer = Renderer(image_size=image_size, uv_size=uv_size)

    k1, k2, k3, k4, k5 = jax.random.split(key, 5)
    vertices = jax.random.normal(k1, (N, V, 3), jnp.float32)
    txy = jax.random.uniform(k2, (N, V, 2), jnp.float32, minval=-0.9, maxval=0.9)
    tz = jax.random.uniform(k5, (N, V, 1), jnp.float32, minval=0.1, maxval=1.0)
    transformed_vertices = jnp.concatenate([txy, tz], axis=-1)
    albedos = jax.random.uniform(k3, (N, 3, uv_size, uv_size), jnp.float32)
    lights = 0.5 * jax.random.normal(k4, (N, 9, 3), jnp.float32)   # SH coeffs

    outputs = renderer(vertices, transformed_vertices, albedos, lights)
    jax.block_until_ready(outputs)

    assert outputs['images'].shape == (N, 3, image_size, image_size)
    assert outputs['albedo_images'].shape == (N, 3, image_size, image_size)
    assert outputs['shading_images'].shape == (N, 3, image_size, image_size)
    assert outputs['alpha_images'].shape == (N, 1, image_size, image_size)
    assert outputs['pos_mask'].shape == (N, 1, image_size, image_size)
    assert outputs['grid'].shape == (N, image_size, image_size, 2)
    print("KERNEL_OK")
</pallas_src>

<mosaic_0001>
module attributes {stable_mosaic.version = 11 : i64} {
  func.func @_render_kernel(%arg0: i32, %arg1: i32, %arg2: memref<2x36xf32, #tpu.memory_space<smem>>, %arg3: memref<1x3x6x4xf32, #tpu.memory_space<vmem>>, %arg4: memref<2x27xf32, #tpu.memory_space<smem>>, %arg5: memref<1x3x16x16xf32, #tpu.memory_space<vmem>>, %arg6: memref<1x13x256xf32, #tpu.memory_space<vmem>>) attributes {dimension_semantics = [#tpu.dimension_semantics<parallel>, #tpu.dimension_semantics<parallel>], iteration_bounds = array<i64: 2, 1>, scalar_prefetch = 0 : i64, scratch_operands = 0 : i64, tpu.core_type = #tpu.core_type<tc>, window_params = [{transform_indices = @transform_0, window_bounds = array<i64: 2, 36>}, {transform_indices = @transform_1, window_bounds = array<i64: 1, 3, 6, 4>}, {transform_indices = @transform_2, window_bounds = array<i64: 2, 27>}, {transform_indices = @transform_3, window_bounds = array<i64: 1, 3, 16, 16>}, {transform_indices = @transform_4, window_bounds = array<i64: 1, 13, 256>}]} {
    %0 = tpu.iota {dimensions = array<i32: 1>} : vector<1x256xi32>
    %c256_i32 = arith.constant 256 : i32
    %1 = arith.muli %arg1, %c256_i32 : i32
    %2 = vector.broadcast %1 : i32 to vector<1x256xi32>
    %3 = arith.addi %2, %0 : vector<1x256xi32>
    %c4_i32 = arith.constant 4 : i32
    %4 = vector.broadcast %c4_i32 : i32 to vector<1x256xi32>
    %5 = arith.shrsi %3, %4 : vector<1x256xi32>
    %6 = arith.sitofp %5 : vector<1x256xi32> to vector<1x256xf32>
    %c15_i32 = arith.constant 15 : i32
    %7 = vector.broadcast %c15_i32 : i32 to vector<1x256xi32>
    %8 = arith.andi %3, %7 : vector<1x256xi32>
    %9 = arith.sitofp %8 : vector<1x256xi32> to vector<1x256xf32>
    %cst = arith.constant 1.500000e+01 : f32
    %10 = vector.broadcast %cst : f32 to vector<1x256xf32>
    %11 = arith.subf %10, %6 : vector<1x256xf32>
    %cst_0 = arith.constant 2.000000e+00 : f32
    %12 = vector.broadcast %cst_0 : f32 to vector<1x256xf32>
    %13 = arith.mulf %12, %11 : vector<1x256xf32>
    %cst_1 = arith.constant 1.000000e+00 : f32
    %14 = vector.broadcast %cst_1 : f32 to vector<1x256xf32>
    %15 = arith.addf %13, %14 : vector<1x256xf32>
    %cst_2 = arith.constant 1.600000e+01 : f32
    %16 = vector.broadcast %cst_2 : f32 to vector<1x256xf32>
    %17 = arith.divf %15, %16 : vector<1x256xf32>
    %cst_3 = arith.constant 1.000000e+00 : f32
    %18 = vector.broadcast %cst_3 : f32 to vector<1x256xf32>
    %19 = arith.subf %17, %18 : vector<1x256xf32>
    %cst_4 = arith.constant 1.500000e+01 : f32
    %20 = vector.broadcast %cst_4 : f32 to vector<1x256xf32>
    %21 = arith.subf %20, %9 : vector<1x256xf32>
    %cst_5 = arith.constant 2.000000e+00 : f32
    %22 = vector.broadcast %cst_5 : f32 to vector<1x256xf32>
    %23 = arith.mulf %22, %21 : vector<1x256xf32>
    %cst_6 = arith.constant 1.000000e+00 : f32
    %24 = vector.broadcast %cst_6 : f32 to vector<1x256xf32>
    %25 = arith.addf %23, %24 : vector<1x256xf32>
    %cst_7 = arith.constant 1.600000e+01 : f32
    %26 = vector.broadcast %cst_7 : f32 to vector<1x256xf32>
    %27 = arith.divf %25, %26 : vector<1x256xf32>
    %cst_8 = arith.constant 1.000000e+00 : f32
    %28 = vector.broadcast %cst_8 : f32 to vector<1x256xf32>
    %29 = arith.subf %27, %28 : vector<1x256xf32>
    %cst_9 = arith.constant 0.000000e+00 : f32
    %30 = vector.broadcast %cst_9 : f32 to vector<1x256xf32>
    %cst_10 = arith.constant 0x7F800000 : f32
    %31 = vector.broadcast %cst_10 : f32 to vector<1x256xf32>
    %c0_i32 = arith.constant 0 : i32
    %32 = vector.broadcast %c0_i32 : i32 to vector<1x256xi32>
    %c0_i32_11 = arith.constant 0 : i32
    %c9_i32 = arith.constant 9 : i32
    %33 = arith.muli %c0_i32_11, %c9_i32 : i32
    %c0_i32_12 = arith.constant 0 : i32
    %34 = arith.addi %33, %c0_i32_12 : i32
    %35 = arith.index_cast %arg0 : i32 to index
    %36 = arith.index_cast %34 : i32 to index
    %37 = memref.load %arg2[%35, %36] : memref<2x36xf32, #tpu.memory_space<smem>>
    %c1_i32 = arith.constant 1 : i32
    %38 = arith.addi %33, %c1_i32 : i32
    %39 = arith.index_cast %arg0 : i32 to index
    %40 = arith.index_cast %38 : i32 to index
    %41 = memref.load %arg2[%39, %40] : memref<2x36xf32, #tpu.memory_space<smem>>
    %c2_i32 = arith.constant 2 : i32
    %42 = arith.addi %33, %c2_i32 : i32
    %43 = arith.index_cast %arg0 : i32 to index
    %44 = arith.index_cast %42 : i32 to index
    %45 = memref.load %arg2[%43, %44] : memref<2x36xf32, #tpu.memory_space<smem>>
    %c3_i32 = arith.constant 3 : i32
    %46 = arith.addi %33, %c3_i32 : i32
    %47 = arith.index_cast %arg0 : i32 to index
    %48 = arith.index_cast %46 : i32 to index
    %49 = memref.load %arg2[%47, %48] : memref<2x36xf32, #tpu.memory_space<smem>>
    %c4_i32_13 = arith.constant 4 : i32
    %50 = arith.addi %33, %c4_i32_13 : i32
    %51 = arith.index_cast %arg0 : i32 to index
    %52 = arith.index_cast %50 : i32 to index
    %53 = memref.load %arg2[%51, %52] : memref<2x36xf32, #tpu.memory_space<smem>>
    %c5_i32 = arith.constant 5 : i32
    %54 = arith.addi %33, %c5_i32 : i32
    %55 = arith.index_cast %arg0 : i32 to index
    %56 = arith.index_cast %54 : i32 to index
    %57 = memref.load %arg2[%55, %56] : memref<2x36xf32, #tpu.memory_space<smem>>
    %c6_i32 = arith.constant 6 : i32
    %58 = arith.addi %33, %c6_i32 : i32
    %59 = arith.index_cast %arg0 : i32 to index
    %60 = arith.index_cast %58 : i32 to index
    %61 = memref.load %arg2[%59, %60] : memref<2x36xf32, #tpu.memory_space<smem>>
    %c7_i32 = arith.constant 7 : i32
    %62 = arith.addi %33, %c7_i32 : i32
    %63 = arith.index_cast %arg0 : i32 to index
    %64 = arith.index_cast %62 : i32 to index
    %65 = memref.load %arg2[%63, %64] : memref<2x36xf32, #tpu.memory_space<smem>>
    %c8_i32 = arith.constant 8 : i32
    %66 = arith.addi %33, %c8_i32 : i32
    %67 = arith.index_cast %arg0 : i32 to index
    %68 = arith.index_cast %66 : i32 to index
    %69 = memref.load %arg2[%67, %68] : memref<2x36xf32, #tpu.memory_space<smem>>
    %70 = arith.subf %61, %37 : f32
    %71 = arith.subf %53, %41 : f32
    %72 = arith.mulf %70, %71 : f32
    %73 = arith.subf %65, %41 : f32
    %74 = arith.subf %49, %37 : f32
    %75 = arith.mulf %73, %74 : f32
    %76 = arith.subf %72, %75 : f32
    %cst_14 = arith.constant 0.000000e+00 : f32
    %77 = arith.cmpf oge, %76, %cst_14 : f32
    %cst_15 = arith.constant 9.99999993E-9 : f32
    %78 = arith.addf %76, %cst_15 : f32
    %cst_16 = arith.constant 9.99999993E-9 : f32
    %79 = arith.subf %76, %cst_16 : f32
    %80 = arith.select %77, %78, %79 : f32
    %cst_17 = arith.constant 1.000000e+00 : f32
    %81 = arith.divf %cst_17, %80 : f32
    %82 = vector.broadcast %49 : f32 to vector<1x256xf32>
    %83 = arith.subf %29, %82 : vector<1x256xf32>
    %84 = arith.subf %65, %53 : f32
    %85 = vector.broadcast %84 : f32 to vector<1x256xf32>
    %86 = arith.mulf %83, %85 : vector<1x256xf32>
    %87 = vector.broadcast %53 : f32 to vector<1x256xf32>
    %88 = arith.subf %19, %87 : vector<1x256xf32>
    %89 = arith.subf %61, %49 : f32
    %90 = vector.broadcast %89 : f32 to vector<1x256xf32>
    %91 = arith.mulf %88, %90 : vector<1x256xf32>
    %92 = arith.subf %86, %91 : vector<1x256xf32>
    %93 = vector.broadcast %81 : f32 to vector<1x256xf32>
    %94 = arith.mulf %92, %93 : vector<1x256xf32>
    %95 = vector.broadcast %61 : f32 to vector<1x256xf32>
    %96 = arith.subf %29, %95 : vector<1x256xf32>
    %97 = arith.subf %41, %65 : f32
    %98 = vector.broadcast %97 : f32 to vector<1x256xf32>
    %99 = arith.mulf %96, %98 : vector<1x256xf32>
    %100 = vector.broadcast %65 : f32 to vector<1x256xf32>
    %101 = arith.subf %19, %100 : vector<1x256xf32>
    %102 = arith.subf %37, %61 : f32
    %103 = vector.broadcast %102 : f32 to vector<1x256xf32>
    %104 = arith.mulf %101, %103 : vector<1x256xf32>
    %105 = arith.subf %99, %104 : vector<1x256xf32>
    %106 = vector.broadcast %81 : f32 to vector<1x256xf32>
    %107 = arith.mulf %105, %106 : vector<1x256xf32>
    %108 = vector.broadcast %37 : f32 to vector<1x256xf32>
    %109 = arith.subf %29, %108 : vector<1x256xf32>
    %110 = arith.subf %53, %41 : f32
    %111 = vector.broadcast %110 : f32 to vector<1x256xf32>
    %112 = arith.mulf %109, %111 : vector<1x256xf32>
    %113 = vector.broadcast %41 : f32 to vector<1x256xf32>
    %114 = arith.subf %19, %113 : vector<1x256xf32>
    %115 = arith.subf %49, %37 : f32
    %116 = vector.broadcast %115 : f32 to vector<1x256xf32>
    %117 = arith.mulf %114, %116 : vector<1x256xf32>
    %118 = arith.subf %112, %117 : vector<1x256xf32>
    %119 = vector.broadcast %81 : f32 to vector<1x256xf32>
    %120 = arith.mulf %118, %119 : vector<1x256xf32>
    %121 = vector.broadcast %45 : f32 to vector<1x256xf32>
    %122 = arith.mulf %94, %121 : vector<1x256xf32>
    %123 = vector.broadcast %57 : f32 to vector<1x256xf32>
    %124 = arith.mulf %107, %123 : vector<1x256xf32>
    %125 = arith.addf %122, %124 : vector<1x256xf32>
    %126 = vector.broadcast %69 : f32 to vector<1x256xf32>
    %127 = arith.mulf %120, %126 : vector<1x256xf32>
    %128 = arith.addf %125, %127 : vector<1x256xf32>
    %cst_18 = arith.constant 0.000000e+00 : f32
    %129 = vector.broadcast %cst_18 : f32 to vector<1x256xf32>
    %130 = arith.cmpf ogt, %94, %129 : vector<1x256xf32>
    %cst_19 = arith.constant 0.000000e+00 : f32
    %131 = vector.broadcast %cst_19 : f32 to vector<1x256xf32>
    %132 = arith.cmpf ogt, %107, %131 : vector<1x256xf32>
    %133 = arith.andi %130, %132 : vector<1x256xi1>
    %cst_20 = arith.constant 0.000000e+00 : f32
    %134 = vector.broadcast %cst_20 : f32 to vector<1x256xf32>
    %135 = arith.cmpf ogt, %120, %134 : vector<1x256xf32>
    %136 = arith.andi %133, %135 : vector<1x256xi1>
    %cst_21 = arith.constant 0.000000e+00 : f32
    %137 = vector.broadcast %cst_21 : f32 to vector<1x256xf32>
    %138 = arith.cmpf oge, %128, %137 : vector<1x256xf32>
    %139 = arith.andi %136, %138 : vector<1x256xi1>
    %140 = math.absf %76 : f32
    %cst_22 = arith.constant 9.99999993E-9 : f32
    %141 = arith.cmpf ogt, %140, %cst_22 : f32
    %142 = vector.broadcast %141 : i1 to vector<1x256xi1>
    %143 = arith.andi %139, %142 : vector<1x256xi1>
    %144 = arith.cmpf olt, %128, %31 : vector<1x256xf32>
    %145 = arith.andi %143, %144 : vector<1x256xi1>
    %146 = arith.select %145, %128, %31 : vector<1x256xi1>, vector<1x256xf32>
    %147 = arith.select %145, %94, %30 : vector<1x256xi1>, vector<1x256xf32>
    %148 = arith.select %145, %107, %30 : vector<1x256xi1>, vector<1x256xf32>
    %149 = arith.select %145, %120, %30 : vector<1x256xi1>, vector<1x256xf32>
    %150 = vector.broadcast %c0_i32_11 : i32 to vector<1x256xi32>
    %151 = arith.select %145, %150, %32 : vector<1x256xi1>, vector<1x256xi32>
    %c1_i32_23 = arith.constant 1 : i32
    %c9_i32_24 = arith.constant 9 : i32
    %152 = arith.muli %c1_i32_23, %c9_i32_24 : i32
    %c0_i32_25 = arith.constant 0 : i32
    %153 = arith.addi %152, %c0_i32_25 : i32
    %154 = arith.index_cast %arg0 : i32 to index
    %155 = arith.index_cast %153 : i32 to index
    %156 = memref.load %arg2[%154, %155] : memref<2x36xf32, #tpu.memory_space<smem>>
    %c1_i32_26 = arith.constant 1 : i32
    %157 = arith.addi %152, %c1_i32_26 : i32
    %158 = arith.index_cast %arg0 : i32 to index
    %159 = arith.index_cast %157 : i32 to index
    %160 = memref.load %arg2[%158, %159] : memref<2x36xf32, #tpu.memory_space<smem>>
    %c2_i32_27 = arith.constant 2 : i32
    %161 = arith.addi %152, %c2_i32_27 : i32
    %162 = arith.index_cast %arg0 : i32 to index
    %163 = arith.index_cast %161 : i32 to index
    %164 = memref.load %arg2[%162, %163] : memref<2x36xf32, #tpu.memory_space<smem>>
    %c3_i32_28 = arith.constant 3 : i32
    %165 = arith.addi %152, %c3_i32_28 : i32
    %166 = arith.index_cast %arg0 : i32 to index
    %167 = arith.index_cast %165 : i32 to index
    %168 = memref.load %arg2[%166, %167] : memref<2x36xf32, #tpu.memory_space<smem>>
    %c4_i32_29 = arith.constant 4 : i32
    %169 = arith.addi %152, %c4_i32_29 : i32
    %170 = arith.index_cast %arg0 : i32 to index
    %171 = arith.index_cast %169 : i32 to index
    %172 = memref.load %arg2[%170, %171] : memref<2x36xf32, #tpu.memory_space<smem>>
    %c5_i32_30 = arith.constant 5 : i32
    %173 = arith.addi %152, %c5_i32_30 : i32
    %174 = arith.index_cast %arg0 : i32 to index
    %175 = arith.index_cast %173 : i32 to index
    %176 = memref.load %arg2[%174, %175] : memref<2x36xf32, #tpu.memory_space<smem>>
    %c6_i32_31 = arith.constant 6 : i32
    %177 = arith.addi %152, %c6_i32_31 : i32
    %178 = arith.index_cast %arg0 : i32 to index
    %179 = arith.index_cast %177 : i32 to index
    %180 = memref.load %arg2[%178, %179] : memref<2x36xf32, #tpu.memory_space<smem>>
    %c7_i32_32 = arith.constant 7 : i32
    %181 = arith.addi %152, %c7_i32_32 : i32
    %182 = arith.index_cast %arg0 : i32 to index
    %183 = arith.index_cast %181 : i32 to index
    %184 = memref.load %arg2[%182, %183] : memref<2x36xf32, #tpu.memory_space<smem>>
    %c8_i32_33 = arith.constant 8 : i32
    %185 = arith.addi %152, %c8_i32_33 : i32
    %186 = arith.index_cast %arg0 : i32 to index
    %187 = arith.index_cast %185 : i32 to index
    %188 = memref.load %arg2[%186, %187] : memref<2x36xf32, #tpu.memory_space<smem>>
    %189 = arith.subf %180, %156 : f32
    %190 = arith.subf %172, %160 : f32
    %191 = arith.mulf %189, %190 : f32
    %192 = arith.subf %184, %160 : f32
    %193 = arith.subf %168, %156 : f32
    %194 = arith.mulf %192, %193 : f32
    %195 = arith.subf %191, %194 : f32
    %cst_34 = arith.constant 0.000000e+00 : f32
    %196 = arith.cmpf oge, %195, %cst_34 : f32
    %cst_35 = arith.constant 9.99999993E-9 : f32
    %197 = arith.addf %195, %cst_35 : f32
    %cst_36 = arith.constant 9.99999993E-9 : f32
    %198 = arith.subf %195, %cst_36 : f32
    %199 = arith.select %196, %197, %198 : f32
    %cst_37 = arith.constant 1.000000e+00 : f32
    %200 = arith.divf %cst_37, %199 : f32
    %201 = vector.broadcast %168 : f32 to vector<1x256xf32>
    %202 = arith.subf %29, %201 : vector<1x256xf32>
    %203 = arith.subf %184, %172 : f32
    %204 = vector.broadcast %203 : f32 to vector<1x256xf32>
    %205 = arith.mulf %202, %204 : vector<1x256xf32>
    %206 = vector.broadcast %172 : f32 to vector<1x256xf32>
    %207 = arith.subf %19, %206 : vector<1x256xf32>
    %208 = arith.subf %180, %168 : f32
    %209 = vector.broadcast %208 : f32 to vector<1x256xf32>
    %210 = arith.mulf %207, %209 : vector<1x256xf32>
    %211 = arith.subf %205, %210 : vector<1x256xf32>
    %212 = vector.broadcast %200 : f32 to vector<1x256xf32>
    %213 = arith.mulf %211, %212 : vector<1x256xf32>
    %214 = vector.broadcast %180 : f32 to vector<1x256xf32>
    %215 = arith.subf %29, %214 : vector<1x256xf32>
    %216 = arith.subf %160, %184 : f32
    %217 = vector.broadcast %216 : f32 to vector<1x256xf32>
    %218 = arith.mulf %215, %217 : vector<1x256xf32>
    %219 = vector.broadcast %184 : f32 to vector<1x256xf32>
    %220 = arith.subf %19, %219 : vector<1x256xf32>
    %221 = arith.subf %156, %180 : f32
    %222 = vector.broadcast %221 : f32 to vector<1x256xf32>
    %223 = arith.mulf %220, %222 : vector<1x256xf32>
    %224 = arith.subf %218, %223 : vector<1x256xf32>
    %225 = vector.broadcast %200 : f32 to vector<1x256xf32>
    %226 = arith.mulf %224, %225 : vector<1x256xf32>
    %227 = vector.broadcast %156 : f32 to vector<1x256xf32>
    %228 = arith.subf %29, %227 : vector<1x256xf32>
    %229 = arith.subf %172, %160 : f32
    %230 = vector.broadcast %229 : f32 to vector<1x256xf32>
    %231 = arith.mulf %228, %230 : vector<1x256xf32>
    %232 = vector.broadcast %160 : f32 to vector<1x256xf32>
    %233 = arith.subf %19, %232 : vector<1x256xf32>
    %234 = arith.subf %168, %156 : f32
    %235 = vector.broadcast %234 : f32 to vector<1x256xf32>
    %236 = arith.mulf %233, %235 : vector<1x256xf32>
    %237 = arith.subf %231, %236 : vector<1x256xf32>
    %238 = vector.broadcast %200 : f32 to vector<1x256xf32>
    %239 = arith.mulf %237, %238 : vector<1x256xf32>
    %240 = vector.broadcast %164 : f32 to vector<1x256xf32>
    %241 = arith.mulf %213, %240 : vector<1x256xf32>
    %242 = vector.broadcast %176 : f32 to vector<1x256xf32>
    %243 = arith.mulf %226, %242 : vector<1x256xf32>
    %244 = arith.addf %241, %243 : vector<1x256xf32>
    %245 = vector.broadcast %188 : f32 to vector<1x256xf32>
    %246 = arith.mulf %239, %245 : vector<1x256xf32>
    %247 = arith.addf %244, %246 : vector<1x256xf32>
    %cst_38 = arith.constant 0.000000e+00 : f32
    %248 = vector.broadcast %cst_38 : f32 to vector<1x256xf32>
    %249 = arith.cmpf ogt, %213, %248 : vector<1x256xf32>
    %cst_39 = arith.constant 0.000000e+00 : f32
    %250 = vector.broadcast %cst_39 : f32 to vector<1x256xf32>
    %251 = arith.cmpf ogt, %226, %250 : vector<1x256xf32>
    %252 = arith.andi %249, %251 : vector<1x256xi1>
    %cst_40 = arith.constant 0.000000e+00 : f32
    %253 = vector.broadcast %cst_40 : f32 to vector<1x256xf32>
    %254 = arith.cmpf ogt, %239, %253 : vector<1x256xf32>
    %255 = arith.andi %252, %254 : vector<1x256xi1>
    %cst_41 = arith.constant 0.000000e+00 : f32
    %256 = vector.broadcast %cst_41 : f32 to vector<1x256xf32>
    %257 = arith.cmpf oge, %247, %256 : vector<1x256xf32>
    %258 = arith.andi %255, %257 : vector<1x256xi1>
    %259 = math.absf %195 : f32
    %cst_42 = arith.constant 9.99999993E-9 : f32
    %260 = arith.cmpf ogt, %259, %cst_42 : f32
    %261 = vector.broadcast %260 : i1 to vector<1x256xi1>
    %262 = arith.andi %258, %261 : vector<1x256xi1>
    %263 = arith.cmpf olt, %247, %146 : vector<1x256xf32>
    %264 = arith.andi %262, %263 : vector<1x256xi1>
    %265 = arith.select %264, %247, %146 : vector<1x256xi1>, vector<1x256xf32>
    %266 = arith.select %264, %213, %147 : vector<1x256xi1>, vector<1x256xf32>
    %267 = arith.select %264, %226, %148 : vector<1x256xi1>, vector<1x256xf32>
    %268 = arith.select %264, %239, %149 : vector<1x256xi1>, vector<1x256xf32>
    %269 = vector.broadcast %c1_i32_23 : i32 to vector<1x256xi32>
    %270 = arith.select %264, %269, %151 : vector<1x256xi1>, vector<1x256xi32>
    %c2_i32_43 = arith.constant 2 : i32
    %c9_i32_44 = arith.constant 9 : i32
    %271 = arith.muli %c2_i32_43, %c9_i32_44 : i32
    %c0_i32_45 = arith.constant 0 : i32
    %272 = arith.addi %271, %c0_i32_45 : i32
    %273 = arith.index_cast %arg0 : i32 to index
    %274 = arith.index_cast %272 : i32 to index
    %275 = memref.load %arg2[%273, %274] : memref<2x36xf32, #tpu.memory_space<smem>>
    %c1_i32_46 = arith.constant 1 : i32
    %276 = arith.addi %271, %c1_i32_46 : i32
    %277 = arith.index_cast %arg0 : i32 to index
    %278 = arith.index_cast %276 : i32 to index
    %279 = memref.load %arg2[%277, %278] : memref<2x36xf32, #tpu.memory_space<smem>>
    %c2_i32_47 = arith.constant 2 : i32
    %280 = arith.addi %271, %c2_i32_47 : i32
    %281 = arith.index_cast %arg0 : i32 to index
    %282 = arith.index_cast %280 : i32 to index
    %283 = memref.load %arg2[%281, %282] : memref<2x36xf32, #tpu.memory_space<smem>>
    %c3_i32_48 = arith.constant 3 : i32
    %284 = arith.addi %271, %c3_i32_48 : i32
    %285 = arith.index_cast %arg0 : i32 to index
    %286 = arith.index_cast %284 : i32 to index
    %287 = memref.load %arg2[%285, %286] : memref<2x36xf32, #tpu.memory_space<smem>>
    %c4_i32_49 = arith.constant 4 : i32
    %288 = arith.addi %271, %c4_i32_49 : i32
    %289 = arith.index_cast %arg0 : i32 to index
    %290 = arith.index_cast %288 : i32 to index
    %291 = memref.load %arg2[%289, %290] : memref<2x36xf32, #tpu.memory_space<smem>>
    %c5_i32_50 = arith.constant 5 : i32
    %292 = arith.addi %271, %c5_i32_50 : i32
    %293 = arith.index_cast %arg0 : i32 to index
    %294 = arith.index_cast %292 : i32 to index
    %295 = memref.load %arg2[%293, %294] : memref<2x36xf32, #tpu.memory_space<smem>>
    %c6_i32_51 = arith.constant 6 : i32
    %296 = arith.addi %271, %c6_i32_51 : i32
    %297 = arith.index_cast %arg0 : i32 to index
    %298 = arith.index_cast %296 : i32 to index
    %299 = memref.load %arg2[%297, %298] : memref<2x36xf32, #tpu.memory_space<smem>>
    %c7_i32_52 = arith.constant 7 : i32
    %300 = arith.addi %271, %c7_i32_52 : i32
    %301 = arith.index_cast %arg0 : i32 to index
    %302 = arith.index_cast %300 : i32 to index
    %303 = memref.load %arg2[%301, %302] : memref<2x36xf32, #tpu.memory_space<smem>>
    %c8_i32_53 = arith.constant 8 : i32
    %304 = arith.addi %271, %c8_i32_53 : i32
    %305 = arith.index_cast %arg0 : i32 to index
    %306 = arith.index_cast %304 : i32 to index
    %307 = memref.load %arg2[%305, %306] : memref<2x36xf32, #tpu.memory_space<smem>>
    %308 = arith.subf %299, %275 : f32
    %309 = arith.subf %291, %279 : f32
    %310 = arith.mulf %308, %309 : f32
    %311 = arith.subf %303, %279 : f32
    %312 = arith.subf %287, %275 : f32
    %313 = arith.mulf %311, %312 : f32
    %314 = arith.subf %310, %313 : f32
    %cst_54 = arith.constant 0.000000e+00 : f32
    %315 = arith.cmpf oge, %314, %cst_54 : f32
    %cst_55 = arith.constant 9.99999993E-9 : f32
    %316 = arith.addf %314, %cst_55 : f32
    %cst_56 = arith.constant 9.99999993E-9 : f32
    %317 = arith.subf %314, %cst_56 : f32
    %318 = arith.select %315, %316, %317 : f32
    %cst_57 = arith.constant 1.000000e+00 : f32
    %319 = arith.divf %cst_57, %318 : f32
    %320 = vector.broadcast %287 : f32 to vector<1x256xf32>
    %321 = arith.subf %29, %320 : vector<1x256xf32>
    %322 = arith.subf %303, %291 : f32
    %323 = vector.broadcast %322 : f32 to vector<1x256xf32>
    %324 = arith.mulf %321, %323 : vector<1x256xf32>
    %325 = vector.broadcast %291 : f32 to vector<1x256xf32>
    %326 = arith.subf %19, %325 : vector<1x256xf32>
    %327 = arith.subf %299, %287 : f32
    %328 = vector.broadcast %327 : f32 to vector<1x256xf32>
    %329 = arith.mulf %326, %328 : vector<1x256xf32>
    %330 = arith.subf %324, %329 : vector<1x256xf32>
    %331 = vector.broadcast %319 : f32 to vector<1x256xf32>
    %332 = arith.mulf %330, %331 : vector<1x256xf32>
    %333 = vector.broadcast %299 : f32 to vector<1x256xf32>
    %334 = arith.subf %29, %333 : vector<1x256xf32>
    %335 = arith.subf %279, %303 : f32
    %336 = vector.broadcast %335 : f32 to vector<1x256xf32>
    %337 = arith.mulf %334, %336 : vector<1x256xf32>
    %338 = vector.broadcast %303 : f32 to vector<1x256xf32>
    %339 = arith.subf %19, %338 : vector<1x256xf32>
    %340 = arith.subf %275, %299 : f32
    %341 = vector.broadcast %340 : f32 to vector<1x256xf32>
    %342 = arith.mulf %339, %341 : vector<1x256xf32>
    %343 = arith.subf %337, %342 : vector<1x256xf32>
    %344 = vector.broadcast %319 : f32 to vector<1x256xf32>
    %345 = arith.mulf %343, %344 : vector<1x256xf32>
    %346 = vector.broadcast %275 : f32 to vector<1x256xf32>
    %347 = arith.subf %29, %346 : vector<1x256xf32>
    %348 = arith.subf %291, %279 : f32
    %349 = vector.broadcast %348 : f32 to vector<1x256xf32>
    %350 = arith.mulf %347, %349 : vector<1x256xf32>
    %351 = vector.broadcast %279 : f32 to vector<1x256xf32>
    %352 = arith.subf %19, %351 : vector<1x256xf32>
    %353 = arith.subf %287, %275 : f32
    %354 = vector.broadcast %353 : f32 to vector<1x256xf32>
    %355 = arith.mulf %352, %354 : vector<1x256xf32>
    %356 = arith.subf %350, %355 : vector<1x256xf32>
    %357 = vector.broadcast %319 : f32 to vector<1x256xf32>
    %358 = arith.mulf %356, %357 : vector<1x256xf32>
    %359 = vector.broadcast %283 : f32 to vector<1x256xf32>
    %360 = arith.mulf %332, %359 : vector<1x256xf32>
    %361 = vector.broadcast %295 : f32 to vector<1x256xf32>
    %362 = arith.mulf %345, %361 : vector<1x256xf32>
    %363 = arith.addf %360, %362 : vector<1x256xf32>
    %364 = vector.broadcast %307 : f32 to vector<1x256xf32>
    %365 = arith.mulf %358, %364 : vector<1x256xf32>
    %366 = arith.addf %363, %365 : vector<1x256xf32>
    %cst_58 = arith.constant 0.000000e+00 : f32
    %367 = vector.broadcast %cst_58 : f32 to vector<1x256xf32>
    %368 = arith.cmpf ogt, %332, %367 : vector<1x256xf32>
    %cst_59 = arith.constant 0.000000e+00 : f32
    %369 = vector.broadcast %cst_59 : f32 to vector<1x256xf32>
    %370 = arith.cmpf ogt, %345, %369 : vector<1x256xf32>
    %371 = arith.andi %368, %370 : vector<1x256xi1>
    %cst_60 = arith.constant 0.000000e+00 : f32
    %372 = vector.broadcast %cst_60 : f32 to vector<1x256xf32>
    %373 = arith.cmpf ogt, %358, %372 : vector<1x256xf32>
    %374 = arith.andi %371, %373 : vector<1x256xi1>
    %cst_61 = arith.constant 0.000000e+00 : f32
    %375 = vector.broadcast %cst_61 : f32 to vector<1x256xf32>
    %376 = arith.cmpf oge, %366, %375 : vector<1x256xf32>
    %377 = arith.andi %374, %376 : vector<1x256xi1>
    %378 = math.absf %314 : f32
    %cst_62 = arith.constant 9.99999993E-9 : f32
    %379 = arith.cmpf ogt, %378, %cst_62 : f32
    %380 = vector.broadcast %379 : i1 to vector<1x256xi1>
    %381 = arith.andi %377, %380 : vector<1x256xi1>
    %382 = arith.cmpf olt, %366, %265 : vector<1x256xf32>
    %383 = arith.andi %381, %382 : vector<1x256xi1>
    %384 = arith.select %383, %366, %265 : vector<1x256xi1>, vector<1x256xf32>
    %385 = arith.select %383, %332, %266 : vector<1x256xi1>, vector<1x256xf32>
    %386 = arith.select %383, %345, %267 : vector<1x256xi1>, vector<1x256xf32>
    %387 = arith.select %383, %358, %268 : vector<1x256xi1>, vector<1x256xf32>
    %388 = vector.broadcast %c2_i32_43 : i32 to vector<1x256xi32>
    %389 = arith.select %383, %388, %270 : vector<1x256xi1>, vector<1x256xi32>
    %c3_i32_63 = arith.constant 3 : i32
    %c9_i32_64 = arith.constant 9 : i32
    %390 = arith.muli %c3_i32_63, %c9_i32_64 : i32
    %c0_i32_65 = arith.constant 0 : i32
    %391 = arith.addi %390, %c0_i32_65 : i32
    %392 = arith.index_cast %arg0 : i32 to index
    %393 = arith.index_cast %391 : i32 to index
    %394 = memref.load %arg2[%392, %393] : memref<2x36xf32, #tpu.memory_space<smem>>
    %c1_i32_66 = arith.constant 1 : i32
    %395 = arith.addi %390, %c1_i32_66 : i32
    %396 = arith.index_cast %arg0 : i32 to index
    %397 = arith.index_cast %395 : i32 to index
    %398 = memref.load %arg2[%396, %397] : memref<2x36xf32, #tpu.memory_space<smem>>
    %c2_i32_67 = arith.constant 2 : i32
    %399 = arith.addi %390, %c2_i32_67 : i32
    %400 = arith.index_cast %arg0 : i32 to index
    %401 = arith.index_cast %399 : i32 to index
    %402 = memref.load %arg2[%400, %401] : memref<2x36xf32, #tpu.memory_space<smem>>
    %c3_i32_68 = arith.constant 3 : i32
    %403 = arith.addi %390, %c3_i32_68 : i32
    %404 = arith.index_cast %arg0 : i32 to index
    %405 = arith.index_cast %403 : i32 to index
    %406 = memref.load %arg2[%404, %405] : memref<2x36xf32, #tpu.memory_space<smem>>
    %c4_i32_69 = arith.constant 4 : i32
    %407 = arith.addi %390, %c4_i32_69 : i32
    %408 = arith.index_cast %arg0 : i32 to index
    %409 = arith.index_cast %407 : i32 to index
    %410 = memref.load %arg2[%408, %409] : memref<2x36xf32, #tpu.memory_space<smem>>
    %c5_i32_70 = arith.constant 5 : i32
    %411 = arith.addi %390, %c5_i32_70 : i32
    %412 = arith.index_cast %arg0 : i32 to index
    %413 = arith.index_cast %411 : i32 to index
    %414 = memref.load %arg2[%412, %413] : memref<2x36xf32, #tpu.memory_space<smem>>
    %c6_i32_71 = arith.constant 6 : i32
    %415 = arith.addi %390, %c6_i32_71 : i32
    %416 = arith.index_cast %arg0 : i32 to index
    %417 = arith.index_cast %415 : i32 to index
    %418 = memref.load %arg2[%416, %417] : memref<2x36xf32, #tpu.memory_space<smem>>
    %c7_i32_72 = arith.constant 7 : i32
    %419 = arith.addi %390, %c7_i32_72 : i32
    %420 = arith.index_cast %arg0 : i32 to index
    %421 = arith.index_cast %419 : i32 to index
    %422 = memref.load %arg2[%420, %421] : memref<2x36xf32, #tpu.memory_space<smem>>
    %c8_i32_73 = arith.constant 8 : i32
    %423 = arith.addi %390, %c8_i32_73 : i32
    %424 = arith.index_cast %arg0 : i32 to index
    %425 = arith.index_cast %423 : i32 to index
    %426 = memref.load %arg2[%424, %425] : memref<2x36xf32, #tpu.memory_space<smem>>
    %427 = arith.subf %418, %394 : f32
    %428 = arith.subf %410, %398 : f32
    %429 = arith.mulf %427, %428 : f32
    %430 = arith.subf %422, %398 : f32
    %431 = arith.subf %406, %394 : f32
    %432 = arith.mulf %430, %431 : f32
    %433 = arith.subf %429, %432 : f32
    %cst_74 = arith.constant 0.000000e+00 : f32
    %434 = arith.cmpf oge, %433, %cst_74 : f32
    %cst_75 = arith.constant 9.99999993E-9 : f32
    %435 = arith.addf %433, %cst_75 : f32
    %cst_76 = arith.constant 9.99999993E-9 : f32
    %436 = arith.subf %433, %cst_76 : f32
    %437 = arith.select %434, %435, %436 : f32
    %cst_77 = arith.constant 1.000000e+00 : f32
    %438 = arith.divf %cst_77, %437 : f32
    %439 = vector.broadcast %406 : f32 to vector<1x256xf32>
    %440 = arith.subf %29, %439 : vector<1x256xf32>
    %441 = arith.subf %422, %410 : f32
    %442 = vector.broadcast %441 : f32 to vector<1x256xf32>
    %443 = arith.mulf %440, %442 : vector<1x256xf32>
    %444 = vector.broadcast %410 : f32 to vector<1x256xf32>
    %445 = arith.subf %19, %444 : vector<1x256xf32>
    %446 = arith.subf %418, %406 : f32
    %447 = vector.broadcast %446 : f32 to vector<1x256xf32>
    %448 = arith.mulf %445, %447 : vector<1x256xf32>
    %449 = arith.subf %443, %448 : vector<1x256xf32>
    %450 = vector.broadcast %438 : f32 to vector<1x256xf32>
    %451 = arith.mulf %449, %450 : vector<1x256xf32>
    %452 = vector.broadcast %418 : f32 to vector<1x256xf32>
    %453 = arith.subf %29, %452 : vector<1x256xf32>
    %454 = arith.subf %398, %422 : f32
    %455 = vector.broadcast %454 : f32 to vector<1x256xf32>
    %456 = arith.mulf %453, %455 : vector<1x256xf32>
    %457 = vector.broadcast %422 : f32 to vector<1x256xf32>
    %458 = arith.subf %19, %457 : vector<1x256xf32>
    %459 = arith.subf %394, %418 : f32
    %460 = vector.broadcast %459 : f32 to vector<1x256xf32>
    %461 = arith.mulf %458, %460 : vector<1x256xf32>
    %462 = arith.subf %456, %461 : vector<1x256xf32>
    %463 = vector.broadcast %438 : f32 to vector<1x256xf32>
    %464 = arith.mulf %462, %463 : vector<1x256xf32>
    %465 = vector.broadcast %394 : f32 to vector<1x256xf32>
    %466 = arith.subf %29, %465 : vector<1x256xf32>
    %467 = arith.subf %410, %398 : f32
    %468 = vector.broadcast %467 : f32 to vector<1x256xf32>
    %469 = arith.mulf %466, %468 : vector<1x256xf32>
    %470 = vector.broadcast %398 : f32 to vector<1x256xf32>
    %471 = arith.subf %19, %470 : vector<1x256xf32>
    %472 = arith.subf %406, %394 : f32
    %473 = vector.broadcast %472 : f32 to vector<1x256xf32>
    %474 = arith.mulf %471, %473 : vector<1x256xf32>
    %475 = arith.subf %469, %474 : vector<1x256xf32>
    %476 = vector.broadcast %438 : f32 to vector<1x256xf32>
    %477 = arith.mulf %475, %476 : vector<1x256xf32>
    %478 = vector.broadcast %402 : f32 to vector<1x256xf32>
    %479 = arith.mulf %451, %478 : vector<1x256xf32>
    %480 = vector.broadcast %414 : f32 to vector<1x256xf32>
    %481 = arith.mulf %464, %480 : vector<1x256xf32>
    %482 = arith.addf %479, %481 : vector<1x256xf32>
    %483 = vector.broadcast %426 : f32 to vector<1x256xf32>
    %484 = arith.mulf %477, %483 : vector<1x256xf32>
    %485 = arith.addf %482, %484 : vector<1x256xf32>
    %cst_78 = arith.constant 0.000000e+00 : f32
    %486 = vector.broadcast %cst_78 : f32 to vector<1x256xf32>
    %487 = arith.cmpf ogt, %451, %486 : vector<1x256xf32>
    %cst_79 = arith.constant 0.000000e+00 : f32
    %488 = vector.broadcast %cst_79 : f32 to vector<1x256xf32>
    %489 = arith.cmpf ogt, %464, %488 : vector<1x256xf32>
    %490 = arith.andi %487, %489 : vector<1x256xi1>
    %cst_80 = arith.constant 0.000000e+00 : f32
    %491 = vector.broadcast %cst_80 : f32 to vector<1x256xf32>
    %492 = arith.cmpf ogt, %477, %491 : vector<1x256xf32>
    %493 = arith.andi %490, %492 : vector<1x256xi1>
    %cst_81 = arith.constant 0.000000e+00 : f32
    %494 = vector.broadcast %cst_81 : f32 to vector<1x256xf32>
    %495 = arith.cmpf oge, %485, %494 : vector<1x256xf32>
    %496 = arith.andi %493, %495 : vector<1x256xi1>
    %497 = math.absf %433 : f32
    %cst_82 = arith.constant 9.99999993E-9 : f32
    %498 = arith.cmpf ogt, %497, %cst_82 : f32
    %499 = vector.broadcast %498 : i1 to vector<1x256xi1>
    %500 = arith.andi %496, %499 : vector<1x256xi1>
    %501 = arith.cmpf olt, %485, %384 : vector<1x256xf32>
    %502 = arith.andi %500, %501 : vector<1x256xi1>
    %503 = arith.select %502, %485, %384 : vector<1x256xi1>, vector<1x256xf32>
    %504 = arith.select %502, %451, %385 : vector<1x256xi1>, vector<1x256xf32>
    %505 = arith.select %502, %464, %386 : vector<1x256xi1>, vector<1x256xf32>
    %506 = arith.select %502, %477, %387 : vector<1x256xi1>, vector<1x256xf32>
    %507 = vector.broadcast %c3_i32_63 : i32 to vector<1x256xi32>
    %508 = arith.select %502, %507, %389 : vector<1x256xi1>, vector<1x256xi32>
    %c4_i32_83 = arith.constant 4 : i32
    %cst_84 = arith.constant 0x7F800000 : f32
    %509 = vector.broadcast %cst_84 : f32 to vector<1x256xf32>
    %510 = arith.cmpf olt, %503, %509 : vector<1x256xf32>
    %511 = arith.extui %510 : vector<1x256xi1> to vector<1x256xi32>
    %512 = arith.sitofp %511 : vector<1x256xi32> to vector<1x256xf32>
    %513 = tpu.iota {dimensions = array<i32: 0>} : vector<4x256xi32>
    %514 = vector.broadcast %508 : vector<1x256xi32> to vector<4x256xi32>
    %515 = arith.cmpi eq, %513, %514 : vector<4x256xi32>
    %516 = arith.extui %515 : vector<4x256xi1> to vector<4x256xi32>
    %517 = arith.sitofp %516 : vector<4x256xi32> to vector<4x256xf32>
    %c0 = arith.constant 0 : index
    %c0_85 = arith.constant 0 : index
    %c0_86 = arith.constant 0 : index
    %c0_87 = arith.constant 0 : index
    %518 = vector.load %arg3[%c0, %c0_85, %c0_86, %c0_87] : memref<1x3x6x4xf32, #tpu.memory_space<vmem>>, vector<1x1x6x4xf32>
    %519 = vector.shape_cast %518 : vector<1x1x6x4xf32> to vector<6x4xf32>
    %cst_88 = arith.constant dense<0.000000e+00> : vector<6x256xf32>
    %520 = tpu.matmul %519, %517, %cst_88 {dimension_numbers = #tpu.dot_dimension_numbers<[1], [0], [0], [1], [0, 0, 1, 1], [], []>} : vector<6x4xf32>, vector<4x256xf32>, vector<6x256xf32> -> vector<6x256xf32>
    %521 = vector.broadcast %504 : vector<1x256xf32> to vector<6x256xf32>
    %522 = arith.mulf %521, %520 : vector<6x256xf32>
    %c0_89 = arith.constant 0 : index
    %c1 = arith.constant 1 : index
    %c0_90 = arith.constant 0 : index
    %c0_91 = arith.constant 0 : index
    %523 = vector.load %arg3[%c0_89, %c1, %c0_90, %c0_91] : memref<1x3x6x4xf32, #tpu.memory_space<vmem>>, vector<1x1x6x4xf32>
    %524 = vector.shape_cast %523 : vector<1x1x6x4xf32> to vector<6x4xf32>
    %cst_92 = arith.constant dense<0.000000e+00> : vector<6x256xf32>
    %525 = tpu.matmul %524, %517, %cst_92 {dimension_numbers = #tpu.dot_dimension_numbers<[1], [0], [0], [1], [0, 0, 1, 1], [], []>} : vector<6x4xf32>, vector<4x256xf32>, vector<6x256xf32> -> vector<6x256xf32>
    %526 = vector.broadcast %505 : vector<1x256xf32> to vector<6x256xf32>
    %527 = arith.mulf %526, %525 : vector<6x256xf32>
    %528 = arith.addf %522, %527 : vector<6x256xf32>
    %c0_93 = arith.constant 0 : index
    %c2 = arith.constant 2 : index
    %c0_94 = arith.constant 0 : index
    %c0_95 = arith.constant 0 : index
    %529 = vector.load %arg3[%c0_93, %c2, %c0_94, %c0_95] : memref<1x3x6x4xf32, #tpu.memory_space<vmem>>, vector<1x1x6x4xf32>
    %530 = vector.shape_cast %529 : vector<1x1x6x4xf32> to vector<6x4xf32>
    %cst_96 = arith.constant dense<0.000000e+00> : vector<6x256xf32>
    %531 = tpu.matmul %530, %517, %cst_96 {dimension_numbers = #tpu.dot_dimension_numbers<[1], [0], [0], [1], [0, 0, 1, 1], [], []>} : vector<6x4xf32>, vector<4x256xf32>, vector<6x256xf32> -> vector<6x256xf32>
    %532 = vector.broadcast %506 : vector<1x256xf32> to vector<6x256xf32>
    %533 = arith.mulf %532, %531 : vector<6x256xf32>
    %534 = arith.addf %528, %533 : vector<6x256xf32>
    %535 = vector.extract_strided_slice %534 {offsets = [0, 0], sizes = [1, 256], strides = [1, 1]} : vector<6x256xf32> to vector<1x256xf32>
    %536 = vector.extract_strided_slice %534 {offsets = [1, 0], sizes = [1, 256], strides = [1, 1]} : vector<6x256xf32> to vector<1x256xf32>
    %537 = vector.extract_strided_slice %534 {offsets = [2, 0], sizes = [1, 256], strides = [1, 1]} : vector<6x256xf32> to vector<1x256xf32>
    %538 = vector.extract_strided_slice %534 {offsets = [3, 0], sizes = [1, 256], strides = [1, 1]} : vector<6x256xf32> to vector<1x256xf32>
    %539 = vector.extract_strided_slice %534 {offsets = [4, 0], sizes = [1, 256], strides = [1, 1]} : vector<6x256xf32> to vector<1x256xf32>
    %540 = vector.extract_strided_slice %534 {offsets = [5, 0], sizes = [1, 256], strides = [1, 1]} : vector<6x256xf32> to vector<1x256xf32>
    %cst_97 = arith.constant -5.000000e-02 : f32
    %541 = vector.broadcast %cst_97 : f32 to vector<1x256xf32>
    %542 = arith.cmpf olt, %537, %541 : vector<1x256xf32>
    %543 = arith.extui %542 : vector<1x256xi1> to vector<1x256xi32>
    %544 = arith.sitofp %543 : vector<1x256xi32> to vector<1x256xf32>
    %cst_98 = arith.constant 1.000000e+00 : f32
    %545 = vector.broadcast %cst_98 : f32 to vector<1x256xf32>
    %546 = arith.mulf %538, %539 : vector<1x256xf32>
    %547 = arith.mulf %538, %540 : vector<1x256xf32>
    %548 = arith.mulf %539, %540 : vector<1x256xf32>
    %549 = arith.mulf %538, %538 : vector<1x256xf32>
    %550 = arith.mulf %539, %539 : vector<1x256xf32>
    %551 = arith.subf %549, %550 : vector<1x256xf32>
    %cst_99 = arith.constant 3.000000e+00 : f32
    %552 = vector.broadcast %cst_99 : f32 to vector<1x256xf32>
    %553 = arith.mulf %552, %540 : vector<1x256xf32>
    %554 = arith.mulf %553, %540 : vector<1x256xf32>
    %cst_100 = arith.constant 1.000000e+00 : f32
    %555 = vector.broadcast %cst_100 : f32 to vector<1x256xf32>
    %556 = arith.subf %554, %555 : vector<1x256xf32>
    %557 = arith.index_cast %arg0 : i32 to index
    %c0_101 = arith.constant 0 : index
    %558 = memref.load %arg4[%557, %c0_101] : memref<2x27xf32, #tpu.memory_space<smem>>
    %559 = vector.broadcast %558 : f32 to vector<1x256xf32>
    %560 = arith.mulf %545, %559 : vector<1x256xf32>
    %561 = arith.addf %30, %560 : vector<1x256xf32>
    %562 = arith.index_cast %arg0 : i32 to index
    %c3 = arith.constant 3 : index
    %563 = memref.load %arg4[%562, %c3] : memref<2x27xf32, #tpu.memory_space<smem>>
    %564 = vector.broadcast %563 : f32 to vector<1x256xf32>
    %565 = arith.mulf %538, %564 : vector<1x256xf32>
    %566 = arith.addf %561, %565 : vector<1x256xf32>
    %567 = arith.index_cast %arg0 : i32 to index
    %c6 = arith.constant 6 : index
    %568 = memref.load %arg4[%567, %c6] : memref<2x27xf32, #tpu.memory_space<smem>>
    %569 = vector.broadcast %568 : f32 to vector<1x256xf32>
    %570 = arith.mulf %539, %569 : vector<1x256xf32>
    %571 = arith.addf %566, %570 : vector<1x256xf32>
    %572 = arith.index_cast %arg0 : i32 to index
    %c9 = arith.constant 9 : index
    %573 = memref.load %arg4[%572, %c9] : memref<2x27xf32, #tpu.memory_space<smem>>
    %574 = vector.broadcast %573 : f32 to vector<1x256xf32>
    %575 = arith.mulf %540, %574 : vector<1x256xf32>
    %576 = arith.addf %571, %575 : vector<1x256xf32>
    %577 = arith.index_cast %arg0 : i32 to index
    %c12 = arith.constant 12 : index
    %578 = memref.load %arg4[%577, %c12] : memref<2x27xf32, #tpu.memory_space<smem>>
    %579 = vector.broadcast %578 : f32 to vector<1x256xf32>
    %580 = arith.mulf %546, %579 : vector<1x256xf32>
    %581 = arith.addf %576, %580 : vector<1x256xf32>
    %582 = arith.index_cast %arg0 : i32 to index
    %c15 = arith.constant 15 : index
    %583 = memref.load %arg4[%582, %c15] : memref<2x27xf32, #tpu.memory_space<smem>>
    %584 = vector.broadcast %583 : f32 to vector<1x256xf32>
    %585 = arith.mulf %547, %584 : vector<1x256xf32>
    %586 = arith.addf %581, %585 : vector<1x256xf32>
    %587 = arith.index_cast %arg0 : i32 to index
    %c18 = arith.constant 18 : index
    %588 = memref.load %arg4[%587, %c18] : memref<2x27xf32, #tpu.memory_space<smem>>
    %589 = vector.broadcast %588 : f32 to vector<1x256xf32>
    %590 = arith.mulf %548, %589 : vector<1x256xf32>
    %591 = arith.addf %586, %590 : vector<1x256xf32>
    %592 = arith.index_cast %arg0 : i32 to index
    %c21 = arith.constant 21 : index
    %593 = memref.load %arg4[%592, %c21] : memref<2x27xf32, #tpu.memory_space<smem>>
    %594 = vector.broadcast %593 : f32 to vector<1x256xf32>
    %595 = arith.mulf %551, %594 : vector<1x256xf32>
    %596 = arith.addf %591, %595 : vector<1x256xf32>
    %597 = arith.index_cast %arg0 : i32 to index
    %c24 = arith.constant 24 : index
    %598 = memref.load %arg4[%597, %c24] : memref<2x27xf32, #tpu.memory_space<smem>>
    %599 = vector.broadcast %598 : f32 to vector<1x256xf32>
    %600 = arith.mulf %556, %599 : vector<1x256xf32>
    %601 = arith.addf %596, %600 : vector<1x256xf32>
    %602 = arith.index_cast %arg0 : i32 to index
    %c1_102 = arith.constant 1 : index
    %603 = memref.load %arg4[%602, %c1_102] : memref<2x27xf32, #tpu.memory_space<smem>>
    %604 = vector.broadcast %603 : f32 to vector<1x256xf32>
    %605 = arith.mulf %545, %604 : vector<1x256xf32>
    %606 = arith.addf %30, %605 : vector<1x256xf32>
    %607 = arith.index_cast %arg0 : i32 to index
    %c4 = arith.constant 4 : index
    %608 = memref.load %arg4[%607, %c4] : memref<2x27xf32, #tpu.memory_space<smem>>
    %609 = vector.broadcast %608 : f32 to vector<1x256xf32>
    %610 = arith.mulf %538, %609 : vector<1x256xf32>
    %611 = arith.addf %606, %610 : vector<1x256xf32>
    %612 = arith.index_cast %arg0 : i32 to index
    %c7 = arith.constant 7 : index
    %613 = memref.load %arg4[%612, %c7] : memref<2x27xf32, #tpu.memory_space<smem>>
    %614 = vector.broadcast %613 : f32 to vector<1x256xf32>
    %615 = arith.mulf %539, %614 : vector<1x256xf32>
    %616 = arith.addf %611, %615 : vector<1x256xf32>
    %617 = arith.index_cast %arg0 : i32 to index
    %c10 = arith.constant 10 : index
    %618 = memref.load %arg4[%617, %c10] : memref<2x27xf32, #tpu.memory_space<smem>>
    %619 = vector.broadcast %618 : f32 to vector<1x256xf32>
    %620 = arith.mulf %540, %619 : vector<1x256xf32>
    %621 = arith.addf %616, %620 : vector<1x256xf32>
    %622 = arith.index_cast %arg0 : i32 to index
    %c13 = arith.constant 13 : index
    %623 = memref.load %arg4[%622, %c13] : memref<2x27xf32, #tpu.memory_space<smem>>
    %624 = vector.broadcast %623 : f32 to vector<1x256xf32>
    %625 = arith.mulf %546, %624 : vector<1x256xf32>
    %626 = arith.addf %621, %625 : vector<1x256xf32>
    %627 = arith.index_cast %arg0 : i32 to index
    %c16 = arith.constant 16 : index
    %628 = memref.load %arg4[%627, %c16] : memref<2x27xf32, #tpu.memory_space<smem>>
    %629 = vector.broadcast %628 : f32 to vector<1x256xf32>
    %630 = arith.mulf %547, %629 : vector<1x256xf32>
    %631 = arith.addf %626, %630 : vector<1x256xf32>
    %632 = arith.index_cast %arg0 : i32 to index
    %c19 = arith.constant 19 : index
    %633 = memref.load %arg4[%632, %c19] : memref<2x27xf32, #tpu.memory_space<smem>>
    %634 = vector.broadcast %633 : f32 to vector<1x256xf32>
    %635 = arith.mulf %548, %634 : vector<1x256xf32>
    %636 = arith.addf %631, %635 : vector<1x256xf32>
    %637 = arith.index_cast %arg0 : i32 to index
    %c22 = arith.constant 22 : index
    %638 = memref.load %arg4[%637, %c22] : memref<2x27xf32, #tpu.memory_space<smem>>
    %639 = vector.broadcast %638 : f32 to vector<1x256xf32>
    %640 = arith.mulf %551, %639 : vector<1x256xf32>
    %641 = arith.addf %636, %640 : vector<1x256xf32>
    %642 = arith.index_cast %arg0 : i32 to index
    %c25 = arith.constant 25 : index
    %643 = memref.load %arg4[%642, %c25] : memref<2x27xf32, #tpu.memory_space<smem>>
    %644 = vector.broadcast %643 : f32 to vector<1x256xf32>
    %645 = arith.mulf %556, %644 : vector<1x256xf32>
    %646 = arith.addf %641, %645 : vector<1x256xf32>
    %647 = arith.index_cast %arg0 : i32 to index
    %c2_103 = arith.constant 2 : index
    %648 = memref.load %arg4[%647, %c2_103] : memref<2x27xf32, #tpu.memory_space<smem>>
    %649 = vector.broadcast %648 : f32 to vector<1x256xf32>
    %650 = arith.mulf %545, %649 : vector<1x256xf32>
    %651 = arith.addf %30, %650 : vector<1x256xf32>
    %652 = arith.index_cast %arg0 : i32 to index
    %c5 = arith.constant 5 : index
    %653 = memref.load %arg4[%652, %c5] : memref<2x27xf32, #tpu.memory_space<smem>>
    %654 = vector.broadcast %653 : f32 to vector<1x256xf32>
    %655 = arith.mulf %538, %654 : vector<1x256xf32>
    %656 = arith.addf %651, %655 : vector<1x256xf32>
    %657 = arith.index_cast %arg0 : i32 to index
    %c8 = arith.constant 8 : index
    %658 = memref.load %arg4[%657, %c8] : memref<2x27xf32, #tpu.memory_space<smem>>
    %659 = vector.broadcast %658 : f32 to vector<1x256xf32>
    %660 = arith.mulf %539, %659 : vector<1x256xf32>
    %661 = arith.addf %656, %660 : vector<1x256xf32>
    %662 = arith.index_cast %arg0 : i32 to index
    %c11 = arith.constant 11 : index
    %663 = memref.load %arg4[%662, %c11] : memref<2x27xf32, #tpu.memory_space<smem>>
    %664 = vector.broadcast %663 : f32 to vector<1x256xf32>
    %665 = arith.mulf %540, %664 : vector<1x256xf32>
    %666 = arith.addf %661, %665 : vector<1x256xf32>
    %667 = arith.index_cast %arg0 : i32 to index
    %c14 = arith.constant 14 : index
    %668 = memref.load %arg4[%667, %c14] : memref<2x27xf32, #tpu.memory_space<smem>>
    %669 = vector.broadcast %668 : f32 to vector<1x256xf32>
    %670 = arith.mulf %546, %669 : vector<1x256xf32>
    %671 = arith.addf %666, %670 : vector<1x256xf32>
    %672 = arith.index_cast %arg0 : i32 to index
    %c17 = arith.constant 17 : index
    %673 = memref.load %arg4[%672, %c17] : memref<2x27xf32, #tpu.memory_space<smem>>
    %674 = vector.broadcast %673 : f32 to vector<1x256xf32>
    %675 = arith.mulf %547, %674 : vector<1x256xf32>
    %676 = arith.addf %671, %675 : vector<1x256xf32>
    %677 = arith.index_cast %arg0 : i32 to index
    %c20 = arith.constant 20 : index
    %678 = memref.load %arg4[%677, %c20] : memref<2x27xf32, #tpu.memory_space<smem>>
    %679 = vector.broadcast %678 : f32 to vector<1x256xf32>
    %680 = arith.mulf %548, %679 : vector<1x256xf32>
    %681 = arith.addf %676, %680 : vector<1x256xf32>
    %682 = arith.index_cast %arg0 : i32 to index
    %c23 = arith.constant 23 : index
    %683 = memref.load %arg4[%682, %c23] : memref<2x27xf32, #tpu.memory_space<smem>>
    %684 = vector.broadcast %683 : f32 to vector<1x256xf32>
    %685 = arith.mulf %551, %684 : vector<1x256xf32>
    %686 = arith.addf %681, %685 : vector<1x256xf32>
    %687 = arith.index_cast %arg0 : i32 to index
    %c26 = arith.constant 26 : index
    %688 = memref.load %arg4[%687, %c26] : memref<2x27xf32, #tpu.memory_space<smem>>
    %689 = vector.broadcast %688 : f32 to vector<1x256xf32>
    %690 = arith.mulf %556, %689 : vector<1x256xf32>
    %691 = arith.addf %686, %690 : vector<1x256xf32>
    %cst_104 = arith.constant 1.000000e+00 : f32
    %692 = vector.broadcast %cst_104 : f32 to vector<1x256xf32>
    %693 = arith.addf %535, %692 : vector<1x256xf32>
    %cst_105 = arith.constant 1.600000e+01 : f32
    %694 = vector.broadcast %cst_105 : f32 to vector<1x256xf32>
    %695 = arith.mulf %693, %694 : vector<1x256xf32>
    %cst_106 = arith.constant 1.000000e+00 : f32
    %696 = vector.broadcast %cst_106 : f32 to vector<1x256xf32>
    %697 = arith.subf %695, %696 : vector<1x256xf32>
    %cst_107 = arith.constant 5.000000e-01 : f32
    %698 = vector.broadcast %cst_107 : f32 to vector<1x256xf32>
    %699 = arith.mulf %697, %698 : vector<1x256xf32>
    %cst_108 = arith.constant 1.000000e+00 : f32
    %700 = vector.broadcast %cst_108 : f32 to vector<1x256xf32>
    %701 = arith.addf %536, %700 : vector<1x256xf32>
    %cst_109 = arith.constant 1.600000e+01 : f32
    %702 = vector.broadcast %cst_109 : f32 to vector<1x256xf32>
    %703 = arith.mulf %701, %702 : vector<1x256xf32>
    %cst_110 = arith.constant 1.000000e+00 : f32
    %704 = vector.broadcast %cst_110 : f32 to vector<1x256xf32>
    %705 = arith.subf %703, %704 : vector<1x256xf32>
    %cst_111 = arith.constant 5.000000e-01 : f32
    %706 = vector.broadcast %cst_111 : f32 to vector<1x256xf32>
    %707 = arith.mulf %705, %706 : vector<1x256xf32>
    %708 = math.floor %699 : vector<1x256xf32>
    %709 = math.floor %707 : vector<1x256xf32>
    %710 = arith.subf %699, %708 : vector<1x256xf32>
    %cst_112 = arith.constant 1.000000e+00 : f32
    %711 = vector.broadcast %cst_112 : f32 to vector<1x256xf32>
    %712 = arith.subf %711, %710 : vector<1x256xf32>
    %713 = arith.subf %707, %709 : vector<1x256xf32>
    %cst_113 = arith.constant 1.000000e+00 : f32
    %714 = vector.broadcast %cst_113 : f32 to vector<1x256xf32>
    %715 = arith.subf %714, %713 : vector<1x256xf32>
    %716 = arith.fptosi %708 : vector<1x256xf32> to vector<1x256xi32>
    %c1_i32_114 = arith.constant 1 : i32
    %717 = vector.broadcast %c1_i32_114 : i32 to vector<1x256xi32>
    %718 = arith.addi %716, %717 : vector<1x256xi32>
    %719 = arith.fptosi %709 : vector<1x256xf32> to vector<1x256xi32>
    %c1_i32_115 = arith.constant 1 : i32
    %720 = vector.broadcast %c1_i32_115 : i32 to vector<1x256xi32>
    %721 = arith.addi %719, %720 : vector<1x256xi32>
    %722 = tpu.iota {dimensions = array<i32: 0>} : vector<16x256xi32>
    %723 = tpu.iota {dimensions = array<i32: 0>} : vector<16x256xi32>
    %724 = vector.broadcast %716 : vector<1x256xi32> to vector<16x256xi32>
    %725 = arith.cmpi eq, %722, %724 : vector<16x256xi32>
    %726 = arith.extui %725 : vector<16x256xi1> to vector<16x256xi32>
    %727 = arith.sitofp %726 : vector<16x256xi32> to vector<16x256xf32>
    %728 = vector.broadcast %712 : vector<1x256xf32> to vector<16x256xf32>
    %729 = arith.mulf %727, %728 : vector<16x256xf32>
    %730 = vector.broadcast %718 : vector<1x256xi32> to vector<16x256xi32>
    %731 = arith.cmpi eq, %722, %730 : vector<16x256xi32>
    %732 = arith.extui %731 : vector<16x256xi1> to vector<16x256xi32>
    %733 = arith.sitofp %732 : vector<16x256xi32> to vector<16x256xf32>
    %734 = vector.broadcast %710 : vector<1x256xf32> to vector<16x256xf32>
    %735 = arith.mulf %733, %734 : vector<16x256xf32>
    %736 = arith.addf %729, %735 : vector<16x256xf32>
    %737 = vector.broadcast %719 : vector<1x256xi32> to vector<16x256xi32>
    %738 = arith.cmpi eq, %723, %737 : vector<16x256xi32>
    %739 = arith.extui %738 : vector<16x256xi1> to vector<16x256xi32>
    %740 = arith.sitofp %739 : vector<16x256xi32> to vector<16x256xf32>
    %741 = vector.broadcast %715 : vector<1x256xf32> to vector<16x256xf32>
    %742 = arith.mulf %740, %741 : vector<16x256xf32>
    %743 = vector.broadcast %721 : vector<1x256xi32> to vector<16x256xi32>
    %744 = arith.cmpi eq, %723, %743 : vector<16x256xi32>
    %745 = arith.extui %744 : vector<16x256xi1> to vector<16x256xi32>
    %746 = arith.sitofp %745 : vector<16x256xi32> to vector<16x256xf32>
    %747 = vector.broadcast %713 : vector<1x256xf32> to vector<16x256xf32>
    %748 = arith.mulf %746, %747 : vector<16x256xf32>
    %749 = arith.addf %742, %748 : vector<16x256xf32>
    %c0_116 = arith.constant 0 : index
    %c0_117 = arith.constant 0 : index
    %c0_118 = arith.constant 0 : index
    %c0_119 = arith.constant 0 : index
    %750 = vector.load %arg5[%c0_116, %c0_117, %c0_118, %c0_119] : memref<1x3x16x16xf32, #tpu.memory_space<vmem>>, vector<1x1x16x16xf32>
    %751 = vector.shape_cast %750 : vector<1x1x16x16xf32> to vector<16x16xf32>
    %cst_120 = arith.constant dense<0.000000e+00> : vector<16x256xf32>
    %752 = tpu.matmul %751, %736, %cst_120 {dimension_numbers = #tpu.dot_dimension_numbers<[1], [0], [0], [1], [0, 0, 1, 1], [], []>} : vector<16x16xf32>, vector<16x256xf32>, vector<16x256xf32> -> vector<16x256xf32>
    %753 = arith.mulf %752, %749 : vector<16x256xf32>
    %cst_121 = arith.constant dense<0.000000e+00> : vector<256xf32>
    %754 = vector.multi_reduction <add>, %753, %cst_121 [0] : vector<16x256xf32> to vector<256xf32>
    %755 = vector.shape_cast %754 : vector<256xf32> to vector<1x256xf32>
    %c0_122 = arith.constant 0 : index
    %c1_123 = arith.constant 1 : index
    %c0_124 = arith.constant 0 : index
    %c0_125 = arith.constant 0 : index
    %756 = vector.load %arg5[%c0_122, %c1_123, %c0_124, %c0_125] : memref<1x3x16x16xf32, #tpu.memory_space<vmem>>, vector<1x1x16x16xf32>
    %757 = vector.shape_cast %756 : vector<1x1x16x16xf32> to vector<16x16xf32>
    %cst_126 = arith.constant dense<0.000000e+00> : vector<16x256xf32>
    %758 = tpu.matmul %757, %736, %cst_126 {dimension_numbers = #tpu.dot_dimension_numbers<[1], [0], [0], [1], [0, 0, 1, 1], [], []>} : vector<16x16xf32>, vector<16x256xf32>, vector<16x256xf32> -> vector<16x256xf32>
    %759 = arith.mulf %758, %749 : vector<16x256xf32>
    %cst_127 = arith.constant dense<0.000000e+00> : vector<256xf32>
    %760 = vector.multi_reduction <add>, %759, %cst_127 [0] : vector<16x256xf32> to vector<256xf32>
    %761 = vector.shape_cast %760 : vector<256xf32> to vector<1x256xf32>
    %c0_128 = arith.constant 0 : index
    %c2_129 = arith.constant 2 : index
    %c0_130 = arith.constant 0 : index
    %c0_131 = arith.constant 0 : index
    %762 = vector.load %arg5[%c0_128, %c2_129, %c0_130, %c0_131] : memref<1x3x16x16xf32, #tpu.memory_space<vmem>>, vector<1x1x16x16xf32>
    %763 = vector.shape_cast %762 : vector<1x1x16x16xf32> to vector<16x16xf32>
    %cst_132 = arith.constant dense<0.000000e+00> : vector<16x256xf32>
    %764 = tpu.matmul %763, %736, %cst_132 {dimension_numbers = #tpu.dot_dimension_numbers<[1], [0], [0], [1], [0, 0, 1, 1], [], []>} : vector<16x16xf32>, vector<16x256xf32>, vector<16x256xf32> -> vector<16x256xf32>
    %765 = arith.mulf %764, %749 : vector<16x256xf32>
    %cst_133 = arith.constant dense<0.000000e+00> : vector<256xf32>
    %766 = vector.multi_reduction <add>, %765, %cst_133 [0] : vector<16x256xf32> to vector<256xf32>
    %767 = vector.shape_cast %766 : vector<256xf32> to vector<1x256xf32>
    %768 = arith.mulf %755, %601 : vector<1x256xf32>
    %769 = arith.mulf %768, %512 : vector<1x256xf32>
    %770 = arith.mulf %761, %646 : vector<1x256xf32>
    %771 = arith.mulf %770, %512 : vector<1x256xf32>
    %772 = arith.mulf %767, %691 : vector<1x256xf32>
    %773 = arith.mulf %772, %512 : vector<1x256xf32>
    %774 = tpu.concatenate %769, %771, %773, %755, %761, %767, %601, %646, %691, %512, %544, %535, %536 in 0 : vector<1x256xf32>, vector<1x256xf32>, vector<1x256xf32>, vector<1x256xf32>, vector<1x256xf32>, vector<1x256xf32>, vector<1x256xf32>, vector<1x256xf32>, vector<1x256xf32>, vector<1x256xf32>, vector<1x256xf32>, vector<1x256xf32>, vector<1x256xf32> -> vector<13x256xf32>
    %c0_134 = arith.constant 0 : index
    %c0_135 = arith.constant 0 : index
    %c0_136 = arith.constant 0 : index
    %775 = vector.load %arg6[%c0_134, %c0_135, %c0_136] : memref<1x13x256xf32, #tpu.memory_space<vmem>>, vector<1x13x256xf32>
    %776 = vector.shape_cast %775 : vector<1x13x256xf32> to vector<13x256xf32>
    %777 = vector.shape_cast %774 : vector<13x256xf32> to vector<1x13x256xf32>
    tpu.vector_store %arg6[%c0_134, %c0_135, %c0_136], %777 {strides = array<i32>} : memref<1x13x256xf32, #tpu.memory_space<vmem>>, vector<1x13x256xf32>,
    return
  }
  func.func @transform_0(%arg0: i32, %arg1: i32) -> (i32, i32) {
    %c0_i32 = arith.constant 0 : i32
    %c0_i32_0 = arith.constant 0 : i32
    %c0_i32_1 = arith.constant 0 : i32
    return %c0_i32, %c0_i32_0 : i32, i32
  }
  func.func @transform_1(%arg0: i32, %arg1: i32) -> (i32, i32, i32, i32) {
    %c0_i32 = arith.constant 0 : i32
    %c0_i32_0 = arith.constant 0 : i32
    %c0_i32_1 = arith.constant 0 : i32
    %c0_i32_2 = arith.constant 0 : i32
    return %arg0, %c0_i32, %c0_i32_0, %c0_i32_1 : i32, i32, i32, i32
  }
  func.func @transform_2(%arg0: i32, %arg1: i32) -> (i32, i32) {
    %c0_i32 = arith.constant 0 : i32
    %c0_i32_0 = arith.constant 0 : i32
    %c0_i32_1 = arith.constant 0 : i32
    return %c0_i32, %c0_i32_0 : i32, i32
  }
  func.func @transform_3(%arg0: i32, %arg1: i32) -> (i32, i32, i32, i32) {
    %c0_i32 = arith.constant 0 : i32
    %c0_i32_0 = arith.constant 0 : i32
    %c0_i32_1 = arith.constant 0 : i32
    %c0_i32_2 = arith.constant 0 : i32
    return %arg0, %c0_i32, %c0_i32_0, %c0_i32_1 : i32, i32, i32, i32
  }
  func.func @transform_4(%arg0: i32, %arg1: i32) -> (i32, i32, i32) {
    %c0_i32 = arith.constant 0 : i32
    %c0_i32_0 = arith.constant 0 : i32
    return %arg0, %c0_i32, %arg1 : i32, i32, i32
  }
}

</mosaic_0001>

<bundles_post_ra>
// kernel: tpu_custom_call.1
= control target key start
LH: loop header
LB: loop body
LE: loop exit
PB: predicated region body
PF: predicated region fallthrough
CT: control target
= control target key end

     0   :  { %s3836_s0 = inlined_call_operand.vmem [shape: f32[2,36], index: 0, kind: input, shape index: {}]   ;;  %s3837_s1 = inlined_call_operand.vmem [shape: f32[2,3,6,4], index: 1, kind: input, shape index: {}]   ;;  %s3838_s2 = inlined_call_operand.vmem [shape: f32[2,27], index: 2, kind: input, shape index: {}]   ;;  %s3839_s3 = inlined_call_operand.hbm [shape: f32[2,3,16,16], index: 3, kind: input, shape index: {}]   ;;  %s3840_s4 = inlined_call_operand.vmem [shape: f32[2,13,256], index: 4, kind: output, shape index: {}]  }
   0x1   :  { %3887 = sst [smem:[#allocation31_spill]] %s3836_s0 }
   0x2   :  { %3888 = sst [smem:[#allocation32_spill]] %s3837_s1 }
   0x3   :  { %3889 = sst [smem:[#allocation33_spill]] %s3838_s2 }
   0x4   :  { %3890 = sst [smem:[#allocation34_spill]] %s3839_s3 }
   0x5   :  { %3891 = sst [smem:[#allocation35_spill]] %s3840_s4 }
   0x6   :  { %9 = vsyncpa [#allocation4], 0 }
   0x7   :  { %10 = vsyncpa [#allocation6], 0 }
   0x8   :  { %11 = vsyncpa [#allocation3], 0 }
   0x9   :  { %13 = vsyncpa [#allocation3 + $0x1], 0  ;;  %s2217_s15 = smov 0   ;;  %s2219_s16 = smov 0  }
   0xa   :  { %s2221_s17 = smov 0   ;;  %s2223_s18 = smov 0  }
   0xb   :  { %s2225_s19 = smov 0   ;;  %s2227_s20 = smov 0  }
   0xc LB: > { %3892 = sst [smem:[#allocation11_spill]] %s2167_s16  ;;  %s1877_s21 = sadd.s32 4294967295, %s2183_s20   ;;  %s2183_s20 = sphi %s2227_s20, %s19_s20   ;;  %s2179_s19 = sphi %s2225_s19, %s4016_s19   ;;  %s2175_s18 = sphi %s2223_s18, %s4015_s18   ;;  %s2171_s17 = sphi %s2221_s17, %s4014_s17   ;;  %s2167_s16 = sphi %s2219_s16, %s4013_s16   ;;  %s2163_s15 = sphi %s2217_s15, %s4012_s15  }
   0xd   : > { %3893 = sst [smem:[#allocation12_spill]] %s2171_s17  ;;  %s106_s22 = sadd.s32 1, %s2171_s17 }
   0xe   : > { %3894 = sst [smem:[#allocation13_spill]] %s2175_s18  ;;  %p113_p0 = scmp.ne.s32.totalorder %s2171_s17, %s2167_s16 }
   0xf   : > { %3895 = sst [smem:[#allocation14_spill]] %s2179_s19  ;;  %p114_p1 = scmp.eq.s32.totalorder %s2183_s20, 0 }
  0x10   : > { %3896 = sst [smem:[#allocation15_spill]] %s2183_s20  ;;  %p119_p2 = scmp.ne.s32.totalorder %s2167_s16, %s2163_s15 }
  0x11   : > { %p2251_p3 = scmp.eq.s32.totalorder %s1877_s21, 0  ;;  %p115_p4 = por %p114_p1, %p113_p0 }
  0x12   : > { %p1879_p5 = scmp.ge.s32.totalorder %s2183_s20, 1  ;;  %p158_p7 = scmp.lt.s32.totalorder %s2183_s20, 3 }
  0x13   : > { %p2258_p6 = por %p2251_p3, %p119_p2  ;;  %s3899_s0 = sld [smem:[#allocation31_spill]] }
  0x14   : > { %p2266_p8 = pnand %p1879_p5, %p158_p7  ;;  %p1997_p10 = scmp.lt.s32.totalorder %s2183_s20, 2 }
  0x15   : > { %s3901_s2 = sld [smem:[#allocation33_spill]]  ;;  %s2185_s7 = smov [#allocation2]  }
  0x16   : > { %p1984_p9 = pneg %p2266_p8  ;;  %p2278_p12 = pnand %p1997_p10, %p115_p4 }
  0x17   : > { %s2186_s8 = smov [#allocation5]   ;;  %s199_s9 = sand.u32 1, %s2171_s17  }
  0x18   : > { %p1985_p11 = pnand %p1984_p9, %p2251_p3  ;;  %s31_s10 = sadd.s32 1, %s2179_s19 }
  0x19   : > { %s170_s27 = sshll.u32 %s3899_s0, 4  ;;  %p33_p13 = scmp.ge.s32.totalorder %s31_s10, 2  ;;  %s171_s27 = int_to_ptr.vmem [resolvable:$true] %s170_s27 }
  0x1a   : > { %1987 = dma.vmem_to_smem (!%p1985_p11), %s171_s27, 32, %s2185_s7, [#allocation4]  }
  0x1b   : > { %s180_s5 = sshll.u32 %s3901_s2, 4  ;;  %s1958_s11 = smul.u32 48, %s199_s9  ;;  %s181_s5 = int_to_ptr.vmem [resolvable:$true] %s180_s5 }
  0x1c   : > { %1990 = dma.vmem_to_smem (!%p1985_p11), %s181_s5, 32, %s2186_s8, [#allocation6]  }
  0x1d   : > { %s1959_s12 = smul.u32 48, %s2179_s19  ;;  %s4018_s10 = smov (%p33_p13, %s31_s10), 0 }
  0x1e   : > { %3903 = sst [smem:[#allocation16_spill]] %s4018_s10  ;;  %s103_s21 = ssub.s32 %s2179_s19, %s4018_s10 }
  0x1f   : > { %s3904_s3 = sld [smem:[#allocation34_spill]]  ;;  %p104_p0 = scmp.eq.s32.totalorder %s103_s21, 0 }
  0x20   : > { %s203_s26 = scalar_lea.vmem [#allocation7], %s1958_s11  ;;  %s200_s30 = scalar_lea.sflag [#allocation3], %s199_s9 }
  0x21   : > { %s211_s27 = sshll.u32 %s203_s26, 4  ;;  %s2187_s5 = smov 128   ;;  %s212_s27 = int_to_ptr.vmem [resolvable:$true] %s211_s27 }
  0x22   : > { %s2295_s29 = scalar_select %p104_p0, %s2171_s17, %s106_s22  }
  0x23   : > { %s2188_s7 = smov 8   ;;  %223 = sbr.rel (%p2266_p8) target bundleno = 568 (0x238), region = 36 }
  0x24   : > { %3905 = sst [smem:[#allocation17_spill]] %s2295_s29 }
  0x25   : > { %s208_s15 = scalar_lea.hbm %s3904_s3, %s1959_s12 }
  0x26   : > { %s209_s25 = sshll.u32 %s208_s15, 4  ;;  %s210_s25 = int_to_ptr.hbm [resolvable:$true] %s209_s25 }
  0x27   : > { %1994 = dma.hbm_to_vmem [thread:$0]  (!%p2278_p12), %s210_s25, 768, %s212_s27, %s200_s30, %s2187_s5, %s2187_s5, %s2188_s7  }
  0x28   : > { %2150 = dma.done.wait (%p2251_p3), [#allocation4], 32  }
  0x29   : > { %2152 = vsyncadd (%p2251_p3), [#allocation4], 4294967264 }
  0x2a   : > { %2154 = dma.done.wait (%p2251_p3), [#allocation6], 32  }
  0x2b   : > { %2156 = vsyncadd (%p2251_p3), [#allocation6], 4294967264  ;;  %s235_s22 = sand.u32 1, %s2167_s16  }
  0x2c   : > { %s1960_s6 = smul.u32 48, %s235_s22  ;;  %s236_s8 = scalar_lea.sflag [#allocation3], %s235_s22 }
  0x2e   : > { %s2310_s9 = scalar_lea.vmem [#allocation7], %s1960_s6 }
  0x2f   : > { %3906 = sst [smem:[#allocation18_spill]] %s2310_s9 }
  0x30   : > { %2158 = dma.done.wait (%p2258_p6), %s236_s8, 768  }
  0x31   : > { %2160 = vsyncadd (%p2258_p6), %s236_s8, 4294966528 }
  0x32   : > { %245 = sfence }
  0x33   : > { %s2317_s28 = sshll.u32 %s2175_s18, 7  ;;  %v290_v20 = vlaneseq  ;;  %v2189_v21 = vmov 16.0  }
  0x34   : > { %s2320_s23 = sld [smem:[#allocation2 + %s2317_s28]]  ;;  %s3843_s24 = sadd.s32 1, %s2317_s28 }
  0x35   : > { %s2325_s11 = sld [smem:[#allocation2 + %s3843_s24]]  ;;  %s3842_s12 = sadd.s32 3, %s2317_s28  ;;  %v291_v24 = vand.u32 127, %v290_v20 }
  0x36   : > { %s2330_s13 = sld [smem:[#allocation2 + %s3842_s12]]  ;;  %s3846_s14 = sadd.s32 4, %s2317_s28 }
  0x37   : > { %s2335_s15 = sld [smem:[#allocation2 + %s3846_s14]]  ;;  %s3841_s21 = sadd.s32 6, %s2317_s28  ;;  %v292_v26 = vadd.s32 128, %v291_v24  ;;  %v297_v27 = vshra.s32 %v291_v24, 4  ;;  %v301_v28 = vand.u32 15, %v291_v24 }
  0x38   : > { %s2340_s25 = sld [smem:[#allocation2 + %s3841_s21]]  ;;  %s3844_s26 = sadd.s32 7, %s2317_s28 }
  0x39   : > { %s2345_s27 = sld [smem:[#allocation2 + %s3844_s26]]  ;;  %s3845_s30 = sadd.s32 9, %s2317_s28  ;;  %v298_v30 = vshra.s32 %v292_v26, 4  ;;  %v299_v31 = vcvt.s32.f32 %v297_v27  ;;  %v302_v32 = vand.u32 15, %v292_v26  ;;  %v303_v35 = vcvt.s32.f32 %v301_v28 }
  0x3a   : > { %s2350_s5 = sld [smem:[#allocation2 + %s3845_s30]]  ;;  %s3847_s7 = sadd.s32 10, %s2317_s28 }
  0x3b   : > { %s2355_s22 = sld [smem:[#allocation2 + %s3847_s7]]  ;;  %s3850_s8 = sadd.s32 12, %s2317_s28  ;;  %v300_v36 = vcvt.s32.f32 %v298_v30  ;;  %v304_v37 = vcvt.s32.f32 %v302_v32  ;;  %v305_v38 = vsub.f32 15.0, %v299_v31  ;;  %v322_v41 = vsub.f32 15.0, %v303_v35 }
  0x3c   : > { %s2359_s6 = ssub.f32 %s2330_s13, %s2320_s23  ;;  %s3852_s12 = sadd.s32 13, %s2317_s28  ;;  %v377_v54 = vstv %s2330_s13 }
  0x3d   : > { %s2364_s21 = ssub.f32 %s2335_s15, %s2325_s11  ;;  %s3851_s26 = sadd.s32 15, %s2317_s28  ;;  %v306_v44 = vsub.f32 15.0, %v300_v36  ;;  %v307_v45 = vmul.f32 2.0, %v305_v38  ;;  %v323_v48 = vsub.f32 15.0, %v304_v37  ;;  %v324_v49 = vmul.f32 2.0, %v322_v41 }
  0x3e   : > { %s350_s24 = ssub.f32 %s2340_s25, %s2320_s23  ;;  %s3853_s14 = sadd.s32 16, %s2317_s28  ;;  %v384_v55 = vstv %s2335_s15  ;;  %v423_v28 = vstv %s2359_s6 }
  0x3f   : > { %s353_s30 = ssub.f32 %s2345_s27, %s2325_s11  ;;  %s3861_s4 = sadd.s32 22, %s2317_s28  ;;  %v308_v51 = vmul.f32 2.0, %v306_v44  ;;  %v325_v53 = vmul.f32 2.0, %v323_v48  ;;  %v309_v58 = vadd.f32 1.0, %v307_v45  ;;  %v326_v63 = vadd.f32 1.0, %v324_v49 }
  0x40   : > { %3907 = sst [smem:[#allocation19_spill]] %s2350_s5  ;;  %s352_s0 = smul.f32 %s2364_s21, %s350_s24 }
  0x41   : > { %3908 = sst [smem:[#allocation20_spill]] %s2355_s22  ;;  %s355_s2 = smul.f32 %s2359_s6, %s353_s30  ;;  %v310_v62 = vadd.f32 1.0, %v308_v51 }
  0x42   : > { %s2376_s7 = sld [smem:[#allocation2 + %s3850_s8]]  ;;  %s3885_s6 = sadd.s32 8, %s2317_s28 }
  0x43   : > { %s2381_s3 = sld [smem:[#allocation2 + %s3852_s12]]  ;;  %s3858_s12 = sadd.s32 18, %s2317_s28 }
  0x44   : > { %s2385_s10 = sld [smem:[#allocation2 + %s3851_s26]] }
  0x45   : > { %s2387_s19 = ssub.f32 %s352_s0, %s355_s2  ;;  %s3859_s2 = sadd.s32 19, %s2317_s28 }
  0x46   : > { %s2391_s24 = sld [smem:[#allocation2 + %s3853_s14]]  ;;  %s3860_s14 = sadd.s32 21, %s2317_s28 }
  0x47   : > { %3911 = sst [smem:[#allocation23_spill]] %s2387_s19  ;;  %p357_p1 = scmp.ge.f32.partialorder %s2387_s19, 0.0 }
  0x48   : > { %3909 = sst [smem:[#allocation21_spill]] %s2376_s7 }
  0x49   : > { %s358_s30 = sadd.f32 1e-08, %s2387_s19 }
  0x4a   : > { %3910 = sst [smem:[#allocation22_spill]] %s2385_s10 }
  0x4b   : > { %s1895_s8 = sadd.f32 -1e-08, %s2387_s19  ;;  %s782_s19 = sadd.s32 34, %s2317_s28 }
  0x4c   : > { %s2398_s26 = ssub.f32 %s2381_s3, %s2355_s22 }
  0x4d   : > { %s4020_s30 = smov (!%p357_p1, %s358_s30), %s1895_s8  ;;  %s494_s0 = ssub.f32 %s2385_s10, %s2350_s5 }
  0x4e   : > { %3912 = sst [smem:[#allocation24_spill]] %s2398_s26  ;;  %v361_v0 = vstv %s4020_s30 }
  0x4f   : > { %s497_s29 = ssub.f32 %s2391_s24, %s2355_s22  ;;  %2055 = vrcp.f32 %v361_v0  ;;  %s496_s17 = smul.f32 %s2398_s26, %s494_s0  ;;  %v373_v3 = vand.u32 2147483648, %v361_v0  ;;  %vm367_vm0 = vweird.f32 %v361_v0  ;;  %v371_v5 = vand.u32 2147483647, %v361_v0 }
  0x50   : > { %s2410_s16 = ssub.f32 %s2376_s7, %s2350_s5  ;;  %s780_s26 = sadd.s32 33, %s2317_s28 }
  0x51   : > { %s2414_s20 = sld [smem:[#allocation2 + %s3858_s12]]  ;;  %s3864_s12 = sadd.s32 24, %s2317_s28  ;;  %v374_v8 = vor.u32 1.1754944e-38, %v373_v3  ;;  %vm372_vm3 = vcmp.eq.f32.partialorder %v371_v5, 8.507059e+37  ;;  %v327_v3 = vadd.f32 1.0, %v325_v53  ;;  %v396_v5 = vstv %s2340_s25 }
  0x52   : > { %3913 = sst [smem:[#allocation25_spill]] %s2410_s16  ;;  %s499_s9 = smul.f32 %s2410_s16, %s497_s29 }
  0x53   : > { %s2420_s8 = sld [smem:[#allocation2 + %s3859_s2]] }
  0x54   : > { %s2424_s1 = sld [smem:[#allocation2 + %s3860_s14]]  ;;  %s3865_s14 = sadd.s32 25, %s2317_s28 }
  0x55   : > { %s2426_s30 = ssub.f32 %s496_s17, %s499_s9  ;;  %v2056_v1 = vpop.eup %2055 }
  0x56   : > { %s2430_s0 = sld [smem:[#allocation2 + %s3861_s4]]  ;;  %v363_v2 = vmul.f32 %v2056_v1, %v361_v0  ;;  %vm368_vm1 = vweird.f32 %v2056_v1  ;;  %s768_s4 = sadd.s32 27, %s2317_s28 }
  0x57   : > { %3915 = sst [smem:[#allocation27_spill]] %s2426_s30  ;;  %p501_p2 = scmp.ge.f32.partialorder %s2426_s30, 0.0  ;;  %vm369_vm2 = vmor %vm367_vm0, %vm368_vm1 }
  0x58   : > { %s502_s29 = sadd.f32 1e-08, %s2426_s30  ;;  %v364_v4 = vsub.f32 1.0, %v363_v2 }
  0x59   : > { %s1896_s2 = sadd.f32 -1e-08, %s2426_s30  ;;  %s774_s30 = sadd.s32 30, %s2317_s28 }
  0x5a   : > { %3914 = sst [smem:[#allocation26_spill]] %s2424_s1  ;;  %v365_v6 = vmul.f32 %v2056_v1, %v364_v4 }
  0x5b   : > { %s2439_s17 = sld [smem:[#allocation2 + %s3864_s12]]  ;;  %s4022_s29 = smov (!%p501_p2, %s502_s29), %s1896_s2 }
  0x5c   : > { %3916 = sst [smem:[#allocation28_spill]] %s2430_s0  ;;  %v505_v7 = vstv %s4022_s29  ;;  %s770_s2 = sadd.s32 28, %s2317_s28  ;;  %v366_v9 = vadd.f32 %v2056_v1, %v365_v6  ;;  %v403_v6 = vstv %s2345_s27 }
  0x5d   : > { %s2443_s9 = sld [smem:[#allocation2 + %s3865_s14]]  ;;  %2057 = vrcp.f32 %v505_v7  ;;  %s776_s29 = sadd.s32 31, %s2317_s28  ;;  %v517_v14 = vand.u32 2147483648, %v505_v7  ;;  %vm511_vm4 = vweird.f32 %v505_v7  ;;  %v515_v16 = vand.u32 2147483647, %v505_v7 }
  0x5e   : > { %s2448_s18 = ssub.f32 %s2430_s0, %s2420_s8  ;;  %v370_v10 = vsel %vm369_vm2, %v2056_v1, %v366_v9  ;;  %2059 = vrcp.f32 %v2189_v21 }
  0x5f   : > { %s2452_s12 = ssub.f32 %s2424_s1, %s2414_s20  ;;  %v375_v11 = vsel %vm372_vm3, %v374_v8, %v370_v10  ;;  %v518_v18 = vor.u32 1.1754944e-38, %v517_v14  ;;  %vm516_vm7 = vcmp.eq.f32.partialorder %v515_v16, 8.507059e+37 }
  0x60   : > { %s2455_s14 = sld [smem:[#allocation2 + %s768_s4]]  ;;  %1962 = vpush %v375_v11 }
  0x61   : > { %s640_s16 = ssub.f32 %s2439_s17, %s2414_s20 }
  0x62   : > { %s2461_s0 = sld [smem:[#allocation2 + %s770_s2]] }
  0x63   : > { %s642_s5 = smul.f32 %s2448_s18, %s640_s16  ;;  %s643_s22 = ssub.f32 %s2443_s9, %s2420_s8  ;;  %v2058_v12 = vpop.eup %2057 }
  0x64   : > { %s2467_s1 = sld [smem:[#allocation2 + %s774_s30]]  ;;  %v507_v13 = vmul.f32 %v2058_v12, %v505_v7  ;;  %vm512_vm5 = vweird.f32 %v2058_v12  ;;  %v2060_v33 = vpop.eup %2059 }
  0x65   : > { %s645_s10 = smul.f32 %s2452_s12, %s643_s22  ;;  %s2471_s7 = sld [smem:[#allocation2 + %s776_s29]]  ;;  %vm513_vm6 = vmor %vm511_vm4, %vm512_vm5  ;;  %v312_v39 = vmul.f32 16.0, %v2060_v33  ;;  %vm316_vm11 = vweird.f32 %v2060_v33 }
  0x66   : > { %s2473_s4 = sld [smem:[#allocation2 + %s780_s26]]  ;;  %v508_v15 = vsub.f32 1.0, %v507_v13 }
  0x67   : > { %s2475_s2 = ssub.f32 %s642_s5, %s645_s10  ;;  %v313_v47 = vsub.f32 1.0, %v312_v39 }
  0x68   : > { %s2477_s16 = sld [smem:[#allocation2 + %s782_s19]]  ;;  %v509_v17 = vmul.f32 %v2058_v12, %v508_v15 }
  0x69   : > { %3917 = sst [smem:[#allocation29_spill]] %s2475_s2  ;;  %p647_p3 = scmp.ge.f32.partialorder %s2475_s2, 0.0  ;;  %v314_v52 = vmul.f32 %v2060_v33, %v313_v47 }
  0x6a   : > { %s648_s22 = sadd.f32 1e-08, %s2475_s2  ;;  %v510_v19 = vadd.f32 %v2058_v12, %v509_v17 }
  0x6b   : > { %s1897_s26 = sadd.f32 -1e-08, %s2475_s2  ;;  %v315_v2 = vadd.f32 %v2060_v33, %v314_v52 }
  0x6c   : > { %s2484_s10 = ssub.f32 %s2471_s7, %s2461_s0  ;;  %v514_v22 = vsel %vm513_vm6, %v2058_v12, %v510_v19  ;;  %v417_v19 = vstv %s2364_s21 }
  0x6d   : > { %s4024_s22 = smov (!%p647_p3, %s648_s22), %s1897_s26  ;;  %s786_s5 = ssub.f32 %s2473_s4, %s2455_s14  ;;  %v519_v25 = vsel %vm516_vm7, %v518_v18, %v514_v22  ;;  %v317_v9 = vsel %vm316_vm11, %v2060_v33, %v315_v2  ;;  %v414_v18 = vstv %s2320_s23 }
  0x6e   : > { %v651_v23 = vstv %s4024_s22  ;;  %s789_s19 = ssub.f32 %s2477_s16, %s2461_s0  ;;  %1964 = vpush %v519_v25  ;;  %v318_v12 = vmul.f32 %v317_v9, %v309_v58  ;;  %v319_v13 = vmul.f32 %v317_v9, %v310_v62  ;;  %v328_v14 = vmul.f32 %v326_v63, %v317_v9 }
  0x6f   : > { %2061 = vrcp.f32 %v651_v23  ;;  %s788_s30 = smul.f32 %s2484_s10, %s786_s5  ;;  %s2494_s29 = ssub.f32 %s2467_s1, %s2455_s14  ;;  %v661_v29 = vand.u32 2147483647, %v651_v23  ;;  %v663_v34 = vand.u32 2147483648, %v651_v23  ;;  %vm657_vm8 = vweird.f32 %v651_v23 }
  0x70   : > { %s380_s5 = ssub.f32 %s2345_s27, %s2335_s15  ;;  %v329_v16 = vmul.f32 %v327_v3, %v317_v9  ;;  %v2539_v22 = vadd.f32 -1.0, %v318_v12  ;;  %v2543_v24 = vadd.f32 -1.0, %v328_v14  ;;  %v420_v25 = vstv %s2325_s11 }
  0x71   : > { %3918 = sst [smem:[#allocation30_spill]] %s2494_s29  ;;  %s791_s26 = smul.f32 %s2494_s29, %s789_s19  ;;  %vm2503_vm9 = vcmp.eq.f32.partialorder %v661_v29, 8.507059e+37  ;;  %v664_v46 = vor.u32 1.1754944e-38, %v663_v34 }
  0x72   : > { %s399_s29 = ssub.f32 %s2325_s11, %s2345_s27  ;;  %v381_v59 = vstv %s380_s5  ;;  %v2551_v27 = vadd.f32 -1.0, %v329_v16  ;;  %v378_v29 = vsub.f32 %v2543_v24, %v377_v54  ;;  %v385_v30 = vsub.f32 %v2539_v22, %v384_v55 }
  0x73   : > { %s2497_s22 = ssub.f32 %s788_s30, %s791_s26  ;;  %v397_v32 = vsub.f32 %v2543_v24, %v396_v5  ;;  %v404_v36 = vsub.f32 %v2539_v22, %v403_v6  ;;  %v415_v48 = vsub.f32 %v2543_v24, %v414_v18  ;;  %v421_v53 = vsub.f32 %v2539_v22, %v420_v25 }
  0x74   : > { %s387_s26 = ssub.f32 %s2340_s25, %s2330_s13  ;;  %s3886_s13 = sadd.s32 2, %s2317_s28  ;;  %v400_v10 = vstv %s399_s29  ;;  %v379_v34 = vsub.f32 %v2551_v27, %v377_v54  ;;  %v398_v35 = vsub.f32 %v2551_v27, %v396_v5  ;;  %v2569_v37 = vmul.f32 %v381_v59, %v378_v29 }
  0x75   : > { %v2062_v40 = vpop.eup %2061  ;;  %p793_p4 = scmp.ge.f32.partialorder %s2497_s22, 0.0  ;;  %s794_s19 = sadd.f32 1e-08, %s2497_s22  ;;  %v416_v49 = vsub.f32 %v2551_v27, %v414_v18  ;;  %v2612_v60 = vmul.f32 %v423_v28, %v421_v53 }
  0x76   : > { %v653_v42 = vmul.f32 %v2062_v40, %v651_v23  ;;  %s1898_s30 = sadd.f32 -1e-08, %s2497_s22  ;;  %vm658_vm10 = vweird.f32 %v2062_v40  ;;  %v388_v4 = vstv %s387_s26  ;;  %v2541_v23 = vadd.f32 -1.0, %v319_v13  ;;  %s3884_s29 = sadd.s32 5, %s2317_s28 }
  0x77   : > { %s406_s2 = ssub.f32 %s2320_s23, %s2340_s25  ;;  %vm2519_vm12 = vmor %vm657_vm8, %vm658_vm10  ;;  %v2571_v38 = vmul.f32 %v388_v4, %v385_v30  ;;  %v2579_v43 = vmul.f32 %v400_v10, %v398_v35 }
  0x78   : > { %v654_v50 = vsub.f32 1.0, %v653_v42  ;;  %s4026_s19 = smov (!%p793_p4, %s794_s19), %s1898_s30  ;;  %s3925_s15 = sld [smem:[#allocation21_spill]]  ;;  %v386_v31 = vsub.f32 %v2541_v23, %v384_v55  ;;  %v2577_v42 = vmul.f32 %v381_v59, %v379_v34  ;;  %v405_v44 = vsub.f32 %v2541_v23, %v403_v6 }
  0x79   : > { %v797_v57 = vstv %s4026_s19  ;;  %v407_v17 = vstv %s406_s2  ;;  %s3926_s25 = sld [smem:[#allocation22_spill]]  ;;  %v2602_v55 = vmul.f32 %v417_v19, %v415_v48 }
  0x7a   : > { %v655_v56 = vmul.f32 %v2062_v40, %v654_v50  ;;  %2063 = vrcp.f32 %v797_v57  ;;  %v809_v61 = vand.u32 2147483648, %v797_v57  ;;  %v807_v1 = vand.u32 2147483647, %v797_v57  ;;  %s2547_s27 = sld [smem:[#allocation2 + %s3886_s13]] }
  0x7b   : > { %vm803_vm13 = vweird.f32 %v797_v57  ;;  %s524_s23 = ssub.f32 %s2391_s24, %s2381_s3  ;;  %v2573_v39 = vmul.f32 %v388_v4, %v386_v31  ;;  %v2590_v47 = vmul.f32 %v407_v17, %v404_v36  ;;  %v2597_v52 = vmul.f32 %v407_v17, %v405_v44 }
  0x7c   : > { %v656_v0 = vadd.f32 %v2062_v40, %v655_v56  ;;  %v2527_v8 = vor.u32 1.1754944e-38, %v809_v61  ;;  %vm2533_vm14 = vcmp.eq.f32.partialorder %v807_v1, 8.507059e+37  ;;  %s2564_s2 = sld [smem:[#allocation2 + %s3884_s29]]  ;;  %v2604_v56 = vmul.f32 %v417_v19, %v416_v49  ;;  %s486_s29 = sadd.s32 14, %s2317_s28 }
  0x7d   : > { %s3927_s11 = sld [smem:[#allocation23_spill]]  ;;  %v392_v51 = vsub.f32 %v2577_v42, %v2573_v39  ;;  %v411_v59 = vsub.f32 %v2579_v43, %v2597_v52  ;;  %v525_v3 = vstv %s524_s23  ;;  %v547_v19 = vstv %s2391_s24 }
  0x7e   : > { %v660_v7 = vsel %vm2519_vm12, %v2062_v40, %v656_v0  ;;  %v2575_v40 = vmul.f32 %v400_v10, %v397_v32  ;;  %s3930_s5 = sld [smem:[#allocation20_spill]]  ;;  %v426_v0 = vsub.f32 %v2602_v55, %v2612_v60  ;;  %v521_v2 = vstv %s3925_s15 }
  0x7f   : > { %v665_v11 = vsel %vm2503_vm9, %v664_v46, %v660_v7  ;;  %s531_s21 = ssub.f32 %s3926_s25, %s3925_s15  ;;  %v391_v46 = vsub.f32 %v2569_v37, %v2571_v38  ;;  %v522_v5 = vsub.f32 %v2543_v24, %v521_v2  ;;  %v523_v6 = vsub.f32 %v2551_v27, %v521_v2  ;;  %s480_s15 = sadd.s32 11, %s2317_s28 }
  0x80   : > { %1966 = vpush %v665_v11  ;;  %v2064_v21 = vpop.eup %2063  ;;  %v410_v54 = vsub.f32 %v2575_v40, %v2590_v47  ;;  %s3931_s30 = sld [smem:[#allocation26_spill]]  ;;  %v430_v63 = vstv %s2547_s27  ;;  %v528_v7 = vstv %s2381_s3  ;;  %v540_v11 = vstv %s3926_s25 }
  0x81   : > { %v799_v26 = vmul.f32 %v2064_v21, %v797_v57  ;;  %vm804_vm15 = vweird.f32 %v2064_v21  ;;  %v422_v57 = vsub.f32 %v2541_v23, %v420_v25  ;;  %s2619_s26 = sld [smem:[#allocation2 + %s3885_s6]]  ;;  %v530_v9 = vsub.f32 %v2541_v23, %v528_v7 }
  0x82   : > { %vm2584_vm0 = vmor %vm803_vm13, %vm804_vm15  ;;  %v433_v1 = vstv %s2564_s2  ;;  %v532_v10 = vstv %s531_s21  ;;  %v2652_v12 = vmul.f32 %v525_v3, %v522_v5  ;;  %v2654_v13 = vmul.f32 %v525_v3, %v523_v6  ;;  %s492_s21 = sadd.s32 17, %s2317_s28  ;;  %s689_s2 = ssub.f32 %s2420_s8, %s2443_s9 }
  0x83   : > { %v800_v33 = vsub.f32 1.0, %v799_v26  ;;  %s457_s19 = sand.u32 2147483647, %s3927_s11  ;;  %v2621_v62 = vmul.f32 %v423_v28, %v422_v57  ;;  %s3932_s11 = sld [smem:[#allocation19_spill]]  ;;  %v541_v14 = vsub.f32 %v2543_v24, %v540_v11  ;;  %v542_v15 = vsub.f32 %v2551_v27, %v540_v11 }
  0x84   : > { %p2627_p5 = scmp.gt.f32.partialorder %s457_s19, 1e-08  ;;  %s543_s6 = ssub.f32 %s3930_s5, %s2391_s24  ;;  %v2662_v17 = vmul.f32 %v532_v10, %v530_v9  ;;  %v548_v26 = vsub.f32 %v2539_v22, %v547_v19  ;;  %v549_v28 = vsub.f32 %v2541_v23, %v547_v19  ;;  %v564_v48 = vstv %s3930_s5 }
  0x85   : > { %v801_v41 = vmul.f32 %v2064_v21, %v800_v33  ;;  %v427_v4 = vsub.f32 %v2604_v56, %v2621_v62  ;;  %s3935_s24 = sld [smem:[#allocation25_spill]]  ;;  %v566_v60 = vsub.f32 %v2541_v23, %v564_v48  ;;  %v690_v19 = vstv %s689_s2 }
  0x86   : > { %s677_s13 = ssub.f32 %s2439_s17, %s3931_s30  ;;  %v544_v18 = vstv %s543_s6  ;;  %v536_v30 = vsub.f32 %v2654_v13, %v2662_v17 }
  0x87   : > { %v802_v50 = vadd.f32 %v2064_v21, %v801_v41  ;;  %s459_s3 = scalar_select %p2627_p5, 1, 0  ;;  %v2668_v25 = vmul.f32 %v544_v18, %v542_v15  ;;  %v438_v41 = vstv %s2619_s26 }
  0x88   : > { %s2690_s6 = sld [smem:[#allocation2 + %s480_s15]]  ;;  %v678_v15 = vstv %s677_s13  ;;  %s632_s13 = sadd.s32 23, %s2317_s28 }
  0x89   : > { %v806_v58 = vsel %vm2584_vm0, %v2064_v21, %v802_v50  ;;  %s550_s23 = ssub.f32 %s3932_s11, %s3926_s25  ;;  %v2666_v21 = vmul.f32 %v544_v18, %v541_v14  ;;  %v558_v32 = vstv %s3932_s11  ;;  %v2686_v44 = vstv %s459_s3 }
  0x8a   : > { %v811_v61 = vsel %vm2533_vm14, %v2527_v8, %v806_v58  ;;  %v529_v8 = vsub.f32 %v2539_v22, %v528_v7  ;;  %s3934_s25 = sld [smem:[#allocation24_spill]]  ;;  %v559_v35 = vsub.f32 %v2543_v24, %v558_v32  ;;  %v560_v36 = vsub.f32 %v2551_v27, %v558_v32 }
  0x8b   : > { %1968 = vpush %v811_v61  ;;  %v551_v31 = vstv %s550_s23  ;;  %s2696_s11 = sld [smem:[#allocation2 + %s486_s29]]  ;;  %v567_v55 = vstv %s3935_s24  ;;  %v565_v58 = vsub.f32 %v2539_v22, %v564_v48  ;;  %vm461_vm8 = vcmp.eq.s32.totalorder %v2686_v44, 1 }
  0x8c   : > { %v2660_v16 = vmul.f32 %v532_v10, %v529_v8  ;;  %v2679_v33 = vmul.f32 %v551_v31, %v548_v26  ;;  %v2681_v34 = vmul.f32 %v551_v31, %v549_v28  ;;  %s2707_s5 = sld [smem:[#allocation2 + %s492_s21]]  ;;  %v569_v39 = vmul.f32 %v567_v55, %v566_v60 }
  0x8d   : > { %s3936_s26 = sld [smem:[#allocation28_spill]]  ;;  %v667_v8 = vstv %s3931_s30  ;;  %v686_v18 = vstv %s2439_s17  ;;  %v693_v48 = vstv %s2443_s9  ;;  %s638_s30 = sadd.s32 26, %s2317_s28 }
  0x8e   : > { %v535_v29 = vsub.f32 %v2652_v12, %v2660_v16  ;;  %v554_v49 = vsub.f32 %v2666_v21, %v2679_v33  ;;  %v555_v50 = vsub.f32 %v2668_v25, %v2681_v34  ;;  %v668_v10 = vsub.f32 %v2543_v24, %v667_v8  ;;  %s696_s3 = ssub.f32 %s2414_s20, %s2439_s17 }
  0x8f   : > { %v669_v11 = vsub.f32 %v2551_v27, %v667_v8  ;;  %s2857_s17 = sld [smem:[#allocation2 + %s632_s13]] }
  0x90   : > { %v561_v45 = vstv %s3934_s25  ;;  %s2871_s24 = sld [smem:[#allocation2 + %s638_s30]] }
  0x91   : > { %s1963_s19 = spop %1962  ;;  %v2702_v53 = vmul.f32 %v561_v45, %v559_v35  ;;  %v2709_v57 = vmul.f32 %v561_v45, %v560_v36  ;;  %v577_v5 = vstv %s2696_s11  ;;  %v688_v45 = vsub.f32 %v2551_v27, %v686_v18 }
  0x92   : > { %v393_v56 = vstv %s1963_s19  ;;  %v582_v7 = vstv %s2707_s5  ;;  %s3947_s19 = sld [smem:[#allocation27_spill]] }
  0x93   : > { %v2716_v61 = vmul.f32 %v393_v56, %v391_v46  ;;  %v2721_v62 = vmul.f32 %v393_v56, %v392_v51  ;;  %v2726_v2 = vmul.f32 %v410_v54, %v393_v56  ;;  %v2731_v3 = vmul.f32 %v411_v59, %v393_v56  ;;  %s670_s27 = ssub.f32 %s2443_s9, %s3936_s26  ;;  %s626_s9 = sadd.s32 20, %s2317_s28 }
  0x94   : > { %v2733_v37 = vmul.f32 %v426_v0, %v393_v56  ;;  %v2735_v38 = vmul.f32 %v427_v4, %v393_v56  ;;  %v568_v46 = vmul.f32 %v567_v55, %v565_v58  ;;  %v571_v6 = vsub.f32 %v2709_v57, %v569_v39  ;;  %s2847_s25 = sld [smem:[#allocation2 + %s626_s9]] }
  0x95   : > { %v431_v42 = vmul.f32 %v430_v63, %v2716_v61  ;;  %v432_v51 = vmul.f32 %v430_v63, %v2721_v62  ;;  %v434_v40 = vmul.f32 %v433_v1, %v2726_v2  ;;  %v435_v43 = vmul.f32 %v433_v1, %v2731_v3 }
  0x96   : > { %v439_v47 = vmul.f32 %v438_v41, %v2733_v37  ;;  %v440_v52 = vmul.f32 %v438_v41, %v2735_v38  ;;  %vm443_vm1 = vcmp.gt.f32.partialorder %v2716_v61, 0.0  ;;  %vm444_vm2 = vcmp.gt.f32.partialorder %v2721_v62, 0.0 }
  0x97   : > { %v436_v54 = vadd.f32 %v434_v40, %v431_v42  ;;  %v437_v59 = vadd.f32 %v435_v43, %v432_v51  ;;  %vm445_vm3 = vcmp.gt.f32.partialorder %v2726_v2, 0.0  ;;  %vm446_vm4 = vcmp.gt.f32.partialorder %v2731_v3, 0.0 }
  0x98   : > { %vm447_vm5 = vmand %vm443_vm1, %vm445_vm3  ;;  %vm449_vm6 = vcmp.gt.f32.partialorder %v2733_v37, 0.0  ;;  %vm450_vm7 = vcmp.gt.f32.partialorder %v2735_v38, 0.0  ;;  %v574_v63 = vstv %s2690_s6  ;;  %v570_v4 = vsub.f32 %v2702_v53, %v568_v46  ;;  %s842_s6 = ssub.f32 %s2455_s14, %s2473_s4 }
  0x99   : > { %v2763_v0 = vadd.f32 %v439_v47, %v436_v54  ;;  %v2765_v1 = vadd.f32 %v440_v52, %v437_v59  ;;  %vm448_vm9 = vmand %vm444_vm2, %vm446_vm4  ;;  %v671_v9 = vstv %s670_s27  ;;  %v674_v14 = vstv %s3936_s26  ;;  %s784_s26 = sadd.s32 35, %s2317_s28  ;;  %s3950_s27 = sld [smem:[#allocation29_spill]] }
  0x9a   : > { %vm451_vm10 = vmand %vm447_vm5, %vm449_vm6  ;;  %v2781_v26 = vmul.f32 %v671_v9, %v668_v10  ;;  %v2783_v28 = vmul.f32 %v671_v9, %v669_v11  ;;  %v675_v31 = vsub.f32 %v2539_v22, %v674_v14  ;;  %v676_v32 = vsub.f32 %v2541_v23, %v674_v14  ;;  %s2966_s2 = sld [smem:[#allocation2 + %s784_s26]]  ;;  %s3985_s26 = sadd.s32 8, %s2317_s28 }
  0x9b   : > { %vm452_vm11 = vmand %vm448_vm9, %vm450_vm7  ;;  %vm453_vm12 = vcmp.ge.f32.partialorder %v2763_v0, 0.0  ;;  %vm454_vm13 = vcmp.ge.f32.partialorder %v2765_v1, 0.0  ;;  %v687_v41 = vsub.f32 %v2543_v24, %v686_v18  ;;  %v692_v40 = vmul.f32 %v690_v19, %v688_v45 }
  0x9c   : > { %vm455_vm14 = vmand %vm451_vm10, %vm453_vm12  ;;  %v2827_v13 = vmul.f32 %v678_v15, %v675_v31  ;;  %v2829_v17 = vmul.f32 %v678_v15, %v676_v32  ;;  %v694_v43 = vsub.f32 %v2539_v22, %v693_v48  ;;  %v695_v47 = vsub.f32 %v2541_v23, %v693_v48 }
  0x9d   : > { %vm456_vm15 = vmand %vm452_vm11, %vm454_vm13  ;;  %v691_v51 = vmul.f32 %v690_v19, %v687_v41  ;;  %v697_v52 = vstv %s696_s3  ;;  %v704_v54 = vstv %s2414_s20  ;;  %s816_s20 = ssub.f32 %s2477_s16, %s2471_s7  ;;  %v713_v18 = vstv %s2452_s12 }
  0x9e   : > { %vm2789_vm0 = vmand %vm455_vm14, %vm461_vm8  ;;  %v681_v60 = vsub.f32 %v2781_v26, %v2827_v13  ;;  %v682_v46 = vsub.f32 %v2783_v28, %v2829_v17  ;;  %v698_v8 = vmul.f32 %v697_v52, %v694_v43  ;;  %v699_v9 = vmul.f32 %v697_v52, %v695_v47  ;;  %s835_s12 = ssub.f32 %s2461_s0, %s2477_s16 }
  0x9f   : > { %s1965_s23 = spop %1964  ;;  %vm2798_vm1 = vmand %vm456_vm15, %vm461_vm8  ;;  %v813_v32 = vstv %s2467_s1  ;;  %v720_v41 = vstv %s2847_s25  ;;  %v723_v45 = vstv %s2857_s17  ;;  %v728_v13 = vstv %s2871_s24  ;;  %s3955_s25 = sld [smem:[#allocation13_spill]] }
  0xa0   : > { %v537_v36 = vstv %s1965_s23  ;;  %v700_v19 = vsub.f32 %v691_v51, %v698_v8  ;;  %v701_v26 = vsub.f32 %v692_v40, %v699_v9  ;;  %v814_v48 = vsub.f32 %v2543_v24, %v813_v32  ;;  %s747_s23 = sand.u32 2147483647, %s3950_s27  ;;  %s893_s17 = sand.u32 2147483647, %s2497_s22 }
  0xa1   : > { %v2805_v55 = vmul.f32 %v537_v36, %v535_v29  ;;  %v2810_v56 = vmul.f32 %v537_v36, %v536_v30  ;;  %v2815_v57 = vmul.f32 %v554_v49, %v537_v36  ;;  %v2820_v44 = vmul.f32 %v555_v50, %v537_v36  ;;  %p2986_p7 = scmp.gt.f32.partialorder %s747_s23, 1e-08  ;;  %p2992_p8 = scmp.gt.f32.partialorder %s893_s17, 1e-08 }
  0xa2   : > { %v2822_v12 = vmul.f32 %v570_v4, %v537_v36  ;;  %v2824_v16 = vmul.f32 %v571_v6, %v537_v36  ;;  %v706_v4 = vsub.f32 %v2551_v27, %v704_v54  ;;  %v710_v6 = vstv %s2420_s8  ;;  %s3323_s27 = sld [smem:[#allocation5 + %s480_s15]] }
  0xa3   : > { %v575_v21 = vmul.f32 %v574_v63, %v2805_v55  ;;  %v576_v29 = vmul.f32 %v574_v63, %v2810_v56  ;;  %v578_v25 = vmul.f32 %v577_v5, %v2815_v57  ;;  %v579_v30 = vmul.f32 %v577_v5, %v2820_v44 }
  0xa4   : > { %v583_v33 = vmul.f32 %v582_v7, %v2822_v12  ;;  %v584_v34 = vmul.f32 %v582_v7, %v2824_v16  ;;  %vm587_vm2 = vcmp.gt.f32.partialorder %v2805_v55, 0.0  ;;  %vm588_vm3 = vcmp.gt.f32.partialorder %v2810_v56, 0.0 }
  0xa5   : > { %v580_v49 = vadd.f32 %v578_v25, %v575_v21  ;;  %v581_v50 = vadd.f32 %v579_v30, %v576_v29  ;;  %vm589_vm4 = vcmp.gt.f32.partialorder %v2815_v57, 0.0  ;;  %vm590_vm5 = vcmp.gt.f32.partialorder %v2820_v44, 0.0  ;;  %p275_p9 = scmp.lt.s32.totalorder %s3955_s25, 1 }
  0xa6   : > { %vm2849_vm6 = vmand %vm587_vm2, %vm589_vm4  ;;  %vm593_vm7 = vcmp.gt.f32.partialorder %v2822_v12, 0.0  ;;  %vm594_vm8 = vcmp.gt.f32.partialorder %v2824_v16, 0.0  ;;  %v705_v63 = vsub.f32 %v2543_v24, %v704_v54  ;;  %v707_v5 = vstv %s2448_s18  ;;  %s823_s18 = ssub.f32 %s2473_s4, %s2467_s1  ;;  %s772_s1 = sadd.s32 29, %s2317_s28 }
  0xa7   : > { %v2863_v39 = vadd.f32 %v583_v33, %v580_v49  ;;  %v2865_v42 = vadd.f32 %v584_v34, %v581_v50  ;;  %vm592_vm9 = vmand %vm588_vm3, %vm590_vm5  ;;  %v711_v10 = vsub.f32 %v2539_v22, %v710_v6  ;;  %v712_v11 = vsub.f32 %v2541_v23, %v710_v6  ;;  %s2937_s11 = sld [smem:[#allocation2 + %s772_s1]]  ;;  %s4028_s25 = smov (!%p275_p9, %s3955_s25), 1 }
  0xa8   : > { %vm2880_vm10 = vmand %vm2849_vm6, %vm593_vm7  ;;  %v708_v14 = vmul.f32 %v707_v5, %v705_v63  ;;  %v709_v15 = vmul.f32 %v707_v5, %v706_v4  ;;  %v817_v17 = vstv %s816_s20  ;;  %v820_v21 = vstv %s2471_s7  ;;  %s778_s7 = sadd.s32 32, %s2317_s28  ;;  %s1961_s24 = smul.u32 24, %s4028_s25 }
  0xa9   : > { %vm2890_vm11 = vmand %vm592_vm9, %vm594_vm8  ;;  %v714_v28 = vmul.f32 %v713_v18, %v711_v10  ;;  %v715_v31 = vmul.f32 %v713_v18, %v712_v11  ;;  %v824_v29 = vstv %s823_s18  ;;  %v815_v33 = vsub.f32 %v2551_v27, %v813_v32  ;;  %s2941_s5 = sld [smem:[#allocation2 + %s778_s7]]  ;;  %s3993_s1 = sadd.s32 22, %s2317_s28 }
  0xaa   : > { %v821_v34 = vsub.f32 %v2539_v22, %v820_v21  ;;  %v818_v43 = vmul.f32 %v817_v17, %v814_v48  ;;  %v822_v47 = vsub.f32 %v2541_v23, %v820_v21  ;;  %v832_v5 = vstv %s2473_s4  ;;  %s601_s4 = sand.u32 2147483647, %s3947_s19 }
  0xab   : > { %v716_v36 = vsub.f32 %v708_v14, %v714_v28  ;;  %v717_v30 = vsub.f32 %v709_v15, %v715_v31  ;;  %v819_v4 = vmul.f32 %v817_v17, %v815_v33  ;;  %v836_v11 = vstv %s835_s12  ;;  %p2974_p6 = scmp.gt.f32.partialorder %s601_s4, 1e-08  ;;  %s3972_s12 = sld [smem:[#allocation32_spill]] }
  0xac   : > { %v825_v52 = vmul.f32 %v824_v29, %v821_v34  ;;  %v826_v10 = vmul.f32 %v824_v29, %v822_v47  ;;  %v839_v31 = vstv %s2477_s16  ;;  %v843_v32 = vstv %s842_s6  ;;  %s3953_s16 = sld [smem:[#allocation30_spill]]  ;;  %s3983_s6 = sadd.s32 2, %s2317_s28 }
  0xad   : > { %v840_v17 = vsub.f32 %v2539_v22, %v839_v31  ;;  %v841_v21 = vsub.f32 %v2541_v23, %v839_v31  ;;  %v856_v33 = vstv %s2461_s0  ;;  %s603_s22 = scalar_select %p2974_p6, 1, 0  ;;  %vm464_vm9 = vcmp.lt.f32.partialorder %v2763_v0, inf }
  0xae   : > { %v827_v18 = vsub.f32 %v818_v43, %v825_v52  ;;  %v828_v28 = vsub.f32 %v819_v4, %v826_v10  ;;  %v857_v47 = vsub.f32 %v2539_v22, %v856_v33  ;;  %v858_v52 = vsub.f32 %v2541_v23, %v856_v33  ;;  %s749_s20 = scalar_select %p2986_p7, 1, 0 }
  0xaf   : > { %v844_v34 = vmul.f32 %v843_v32, %v840_v17  ;;  %v845_v43 = vmul.f32 %v843_v32, %v841_v21  ;;  %v869_v10 = vstv %s2941_s5  ;;  %s895_s18 = scalar_select %p2992_p8, 1, 0 }
  0xb0   : > { %v3070_v59 = vstv %s749_s20  ;;  %s3311_s19 = sld [smem:[#allocation5 + %s3983_s6]]  ;;  %s3989_s0 = sadd.s32 10, %s2317_s28 }
  0xb1   : > { %s1967_s8 = spop %1966  ;;  %s3126_s7 = scalar_lea.vmem %s3972_s12, %s1961_s24 }
  0xb2   : > { %v683_v25 = vstv %s1967_s8  ;;  %s3319_s4 = sld [smem:[#allocation5 + %s3985_s26]]  ;;  %s3991_s20 = sadd.s32 16, %s2317_s28 }
  0xb3   : > { %v2909_v49 = vmul.f32 %v683_v25, %v681_v60  ;;  %v2911_v50 = vmul.f32 %v683_v25, %v682_v46  ;;  %v2913_v58 = vmul.f32 %v700_v19, %v683_v25  ;;  %v2915_v51 = vmul.f32 %v701_v26, %v683_v25  ;;  %s3992_s24 = sadd.s32 19, %s2317_s28  ;;  %s3357_s12 = sld [smem:[#allocation5 + %s3993_s1]] }
  0xb4   : > { %v2917_v40 = vmul.f32 %v716_v36, %v683_v25  ;;  %v2939_v9 = vmul.f32 %v717_v30, %v683_v25  ;;  %v833_v19 = vsub.f32 %v2543_v24, %v832_v5  ;;  %v834_v26 = vsub.f32 %v2551_v27, %v832_v5  ;;  %s3353_s8 = sld [smem:[#allocation5 + %s3992_s24]]  ;;  %s3999_s24 = sadd.s32 12, %s2317_s28 }
  0xb5   : > { %v721_v60 = vmul.f32 %v720_v41, %v2909_v49  ;;  %v722_v46 = vmul.f32 %v720_v41, %v2911_v50  ;;  %v724_v54 = vmul.f32 %v723_v45, %v2913_v58  ;;  %v725_v63 = vmul.f32 %v723_v45, %v2915_v51  ;;  %s3383_s26 = sld [smem:[#allocation5 + %s492_s21]] }
  0xb6   : > { %vm733_vm12 = vcmp.gt.f32.partialorder %v2909_v49, 0.0  ;;  %vm734_vm13 = vcmp.gt.f32.partialorder %v2911_v50, 0.0  ;;  %vm735_vm14 = vcmp.gt.f32.partialorder %v2913_v58, 0.0  ;;  %vm736_vm15 = vcmp.gt.f32.partialorder %v2915_v51, 0.0  ;;  %s3530_s1 = sld [smem:[#allocation5 + %s3999_s24]] }
  0xb7   : > { %v726_v6 = vadd.f32 %v724_v54, %v721_v60  ;;  %v2933_v8 = vadd.f32 %v725_v63, %v722_v46  ;;  %vm2946_vm2 = vmand %vm733_vm12, %vm735_vm14  ;;  %v729_v15 = vmul.f32 %v728_v13, %v2917_v40  ;;  %v850_v36 = vstv %s2455_s14  ;;  %s3987_s14 = sadd.s32 7, %s2317_s28 }
  0xb8   : > { %vm2962_vm3 = vmand %vm734_vm13, %vm736_vm15  ;;  %v837_v45 = vmul.f32 %v836_v11, %v833_v19  ;;  %v838_v48 = vmul.f32 %v836_v11, %v834_v26  ;;  %v851_v29 = vsub.f32 %v2543_v24, %v850_v36  ;;  %v852_v25 = vsub.f32 %v2551_v27, %v850_v36  ;;  %s3331_s23 = sld [smem:[#allocation5 + %s3987_s14]] }
  0xb9   : > { %v853_v30 = vstv %s2484_s10  ;;  %v859_v46 = vstv %s3953_s16  ;;  %vm739_vm4 = vcmp.gt.f32.partialorder %v2917_v40, 0.0  ;;  %v866_v5 = vstv %s2937_s11  ;;  %vm3036_vm13 = vmand %vm2789_vm0, %vm464_vm9  ;;  %s3984_s11 = sadd.s32 5, %s2317_s28  ;;  %s3339_s10 = sld [smem:[#allocation5 + %s3989_s0]] }
  0xba   : > { %v854_v27 = vmul.f32 %v853_v30, %v851_v29  ;;  %v855_v60 = vmul.f32 %v853_v30, %v852_v25  ;;  %v846_v63 = vsub.f32 %v837_v45, %v844_v34  ;;  %v847_v4 = vsub.f32 %v838_v48, %v845_v43  ;;  %vm3014_vm7 = vmand %vm2946_vm2, %vm739_vm4  ;;  %v1912_v29 = vld [vmem:[%s3126_s7 + $0x10] sm:$0x3f]  ;;  %s3315_s5 = sld [smem:[#allocation5 + %s3984_s11]] }
  0xbb   : > { %v860_v22 = vmul.f32 %v859_v46, %v857_v47  ;;  %v861_v23 = vmul.f32 %v859_v46, %v858_v52  ;;  %v731_v36 = vadd.f32 %v729_v15, %v726_v6  ;;  %v730_v6 = vmul.f32 %v728_v13, %v2939_v9  ;;  %s3375_s11 = sld [smem:[#allocation5 + %s486_s29]]  ;;  %s3995_s29 = sadd.s32 3, %s2317_s28 }
  0xbc   : > { %s1969_s3 = spop %1968  ;;  %vm740_vm8 = vcmp.gt.f32.partialorder %v2939_v9, 0.0  ;;  %vm597_vm14 = vcmp.ge.f32.partialorder %v2863_v39, 0.0  ;;  %v3041_v13 = vstv %s603_s22  ;;  %v468_v35 = vsel %vm3036_vm13, %v2763_v0, inf  ;;  %s3990_s22 = sadd.s32 13, %s2317_s28 }
  0xbd   : > { %v829_v24 = vstv %s1969_s3  ;;  %v862_v31 = vsub.f32 %v854_v27, %v860_v22  ;;  %v863_v32 = vsub.f32 %v855_v60, %v861_v23  ;;  %vm599_vm0 = vmand %vm2880_vm10, %vm597_vm14  ;;  %vm605_vm2 = vcmp.eq.s32.totalorder %v3041_v13, 1  ;;  %s3988_s3 = sadd.s32 1, %s2317_s28  ;;  %s3343_s15 = sld [smem:[#allocation5 + %s3990_s22]] }
  0xbe   : > { %v2984_v54 = vmul.f32 %v829_v24, %v827_v18  ;;  %v2997_v11 = vmul.f32 %v829_v24, %v828_v28  ;;  %v2999_v18 = vmul.f32 %v846_v63, %v829_v24  ;;  %v3004_v26 = vmul.f32 %v847_v4, %v829_v24  ;;  %vm3086_vm14 = vmand %vm2962_vm3, %vm740_vm8  ;;  %s3335_s17 = sld [smem:[#allocation5 + %s3988_s3]]  ;;  %s3998_s22 = sadd.s32 9, %s2317_s28 }
  0xbf   : > { %v874_v28 = vstv %s2966_s2  ;;  %v3024_v15 = vmul.f32 %v862_v31, %v829_v24  ;;  %v3048_v25 = vmul.f32 %v863_v32, %v829_v24  ;;  %vm743_vm4 = vcmp.ge.f32.partialorder %v731_v36, 0.0  ;;  %v928_v32 = vld [vmem:[%s3126_s7] sm:$0x3f]  ;;  %s3986_s2 = sadd.s32 4, %s2317_s28  ;;  %s3406_s21 = sld [smem:[#allocation5 + %s3995_s29]] }
  0xc0   : > { %v867_v19 = vmul.f32 %v866_v5, %v2984_v54  ;;  %vm879_vm5 = vcmp.gt.f32.partialorder %v2984_v54, 0.0  ;;  %v870_v45 = vmul.f32 %v869_v10, %v2999_v18  ;;  %vm881_vm6 = vcmp.gt.f32.partialorder %v2999_v18, 0.0  ;;  %s3327_s16 = sld [smem:[#allocation5 + %s3986_s2]]  ;;  %s3996_s2 = sadd.s32 6, %s2317_s28 }
  0xc1   : > { %vm3027_vm12 = vmand %vm879_vm5, %vm881_vm6  ;;  %v868_v14 = vmul.f32 %v866_v5, %v2997_v11  ;;  %v871_v30 = vmul.f32 %v869_v10, %v3004_v26  ;;  %v875_v33 = vmul.f32 %v874_v28, %v3024_v15  ;;  %vm885_vm15 = vcmp.gt.f32.partialorder %v3024_v15, 0.0  ;;  %s3413_s14 = sld [smem:[#allocation5 + %s3996_s2]]  ;;  %s4002_s2 = sadd.s32 24, %s2317_s28 }
  0xc2   : > { %v872_v21 = vadd.f32 %v870_v45, %v867_v19  ;;  %vm3061_vm5 = vmand %vm3027_vm12, %vm885_vm15  ;;  %vm608_vm10 = vcmp.lt.f32.partialorder %v2863_v39, %v468_v35  ;;  %v3073_v0 = vadd.f32 %v730_v6, %v2933_v8  ;;  %vm751_vm12 = vcmp.eq.s32.totalorder %v3070_v59, 1  ;;  %s3457_s3 = sld [smem:[#allocation5 + %s2317_s28]] }
  0xc3   : > { %vm606_vm6 = vmand %vm599_vm0, %vm605_vm2  ;;  %v3080_v52 = vstv %s895_s18  ;;  %v873_v27 = vadd.f32 %v871_v30, %v868_v14  ;;  %v876_v8 = vmul.f32 %v874_v28, %v3048_v25  ;;  %v3103_v41 = vshrl.u32 %v290_v20, 7  ;;  %s3347_s18 = sld [smem:[#allocation5 + %s3991_s20]] }
  0xc4   : > { %v3065_v43 = vadd.f32 %v875_v33, %v872_v21  ;;  %vm3075_vm9 = vmand %vm606_vm6, %vm608_vm10  ;;  %vm897_vm6 = vcmp.eq.s32.totalorder %v3080_v52, 1  ;;  %v2190_v46 = vmov 0   ;;  %v470_v4 = vsel %vm3036_vm13, %v2716_v61, 0.0  ;;  %s3997_s0 = sld [smem:[#allocation18_spill]] }
  0xc5   : > { %v612_v60 = vsel %vm3075_vm9, %v2863_v39, %v468_v35  ;;  %vm745_vm15 = vmand %vm3014_vm7, %vm743_vm4  ;;  %v620_v63 = vsel %vm3075_vm9, 1, %v2190_v46  ;;  %vm933_vm7 = vcmask 1043456   ;;  %vm598_vm4 = vcmp.ge.f32.partialorder %v2865_v42, 0.0  ;;  %s3520_s20 = sld [smem:[#allocation5 + %s3998_s22]] }
  0xc6   : > { %vm889_vm0 = vcmp.ge.f32.partialorder %v3065_v43, 0.0  ;;  %vm752_vm3 = vmand %vm745_vm15, %vm751_vm12  ;;  %vm754_vm8 = vcmp.lt.f32.partialorder %v731_v36, %v612_v60  ;;  %v614_v61 = vsel %vm3075_vm9, %v2805_v55, %v470_v4  ;;  %v472_v23 = vsel %vm3036_vm13, %v2726_v2, 0.0  ;;  %s3581_s22 = sld [smem:[#allocation5 + %s4002_s2]] }
  0xc7   : > { %vm3107_vm10 = vmand %vm752_vm3, %vm754_vm8  ;;  %v616_v10 = vsel %vm3075_vm9, %v2815_v57, %v472_v23  ;;  %v474_v55 = vsel %vm3036_vm13, %v2733_v37, 0.0  ;;  %vm465_vm8 = vcmp.lt.f32.partialorder %v2765_v1, inf  ;;  %v3194_v45 = vadd.f32 %v876_v8, %v873_v27 }
  0xc8   : > { %v3117_v22 = vsel %vm3107_vm10, %v731_v36, %v612_v60  ;;  %v766_v20 = vsel %vm3107_vm10, 2, %v620_v63  ;;  %vm891_vm15 = vmand %vm3061_vm5, %vm889_vm0  ;;  %v760_v5 = vsel %vm3107_vm10, %v2909_v49, %v614_v61  ;;  %v762_v49 = vsel %vm3107_vm10, %v2913_v58, %v616_v10  ;;  %v1907_v36 = vld [vmem:[%s3126_s7 + $0x8] sm:$0x3f]  ;;  %s3994_s7 = sadd.s32 25, %s2317_s28 }
  0xc9   : > { %vm898_vm3 = vmand %vm891_vm15, %vm897_vm6  ;;  %vm900_vm5 = vcmp.lt.f32.partialorder %v3065_v43, %v3117_v22  ;;  %vm744_vm15 = vcmp.ge.f32.partialorder %v3073_v0, 0.0  ;;  %v618_v57 = vsel %vm3075_vm9, %v2822_v12, %v474_v55  ;;  %s3361_s6 = sld [smem:[#allocation5 + %s3994_s7]]  ;;  %v1267_v52 = vstv %s3311_s19 }
  0xca   : > { %vm3147_vm0 = vmand %vm898_vm3, %vm900_vm5  ;;  %vm929_vm3 = vcmask 31744   ;;  %v764_v7 = vsel %vm3107_vm10, %v2917_v40, %v618_v57  ;;  %vm886_vm10 = vcmp.gt.f32.partialorder %v3048_v25, 0.0  ;;  %v1270_v24 = vstv %s3315_s5 }
  0xcb   : > { %v912_v19 = vsel %vm3147_vm0, 3, %v766_v20  ;;  %vm3167_vm13 = vmand %vm2798_vm1, %vm465_vm8  ;;  %v3175_v58 = vsel %vm3147_vm0, %v2984_v54, %v760_v5  ;;  %v3180_v12 = vsel %vm3147_vm0, %v2999_v18, %v762_v49  ;;  %v2191_v18 = vmov 0.0  }
  0xcc   : > { %vm922_vm9 = vcmp.eq.s32.totalorder %v3103_v41, %v912_v19  ;;  %v469_v53 = vsel %vm3167_vm13, %v2765_v1, inf  ;;  %vm600_vm1 = vmand %vm2890_vm11, %vm598_vm4  ;;  %v471_v54 = vsel %vm3167_vm13, %v2721_v62, 0.0  ;;  %v473_v1 = vsel %vm3167_vm13, %v2731_v3, 0.0 }
  0xcd   : > { %v1901_v28 = vsel %vm922_vm9, 1.0, %v2191_v18  ;;  %vm607_vm5 = vmand %vm600_vm1, %vm605_vm2  ;;  %vm609_vm8 = vcmp.lt.f32.partialorder %v2865_v42, %v469_v53  ;;  %vm880_vm11 = vcmp.gt.f32.partialorder %v2997_v11, 0.0  ;;  %v475_v48 = vsel %vm3167_vm13, %v2735_v38, 0.0 }
  0xce   : > { %1903 = vmatpush.msk.msra.mxu0 %vm933_vm7, %v1901_v28  ;;  %vm3205_vm4 = vmand %vm607_vm5, %vm609_vm8  ;;  %1908 = vmatpush.msk.msra.mxu2 %vm933_vm7, %v1901_v28  ;;  %vm882_vm2 = vcmp.gt.f32.partialorder %v3004_v26, 0.0  ;;  %v1195_v8 = vstv %s3327_s16  ;;  %v1201_v60 = vstv %s3331_s23  ;;  %v1288_v63 = vstv %s3323_s27  ;;  %s4000_s16 = sadd.s32 18, %s2317_s28  ;;  %s4001_s23 = sadd.s32 15, %s2317_s28 }
  0xcf   : > { %v613_v3 = vsel %vm3205_vm4, %v2865_v42, %v469_v53  ;;  %vm746_vm9 = vmand %vm3086_vm14, %vm744_vm15  ;;  %1904 = vmatmul.msk.f32.vlgmr.msra.gmra.mxu0 %vm929_vm3, %v928_v32  ;;  %1909 = vmatmul.msk.f32.vlgmr.msra.gmra.mxu2 %vm929_vm3, %v1907_v36  ;;  %v615_v40 = vsel %vm3205_vm4, %v2810_v56, %v471_v54  ;;  %v617_v38 = vsel %vm3205_vm4, %v2820_v44, %v473_v1  ;;  %v621_v44 = vsel %vm3205_vm4, 1, %v2190_v46  ;;  %s3559_s7 = sld [smem:[#allocation5 + %s4000_s16]] }
  0xd0   : > { %vm753_vm13 = vmand %vm746_vm9, %vm751_vm12  ;;  %vm755_vm1 = vcmp.lt.f32.partialorder %v3073_v0, %v613_v3  ;;  %1913 = vmatpush.msk.msrb.mxu0 %vm933_vm7, %v1901_v28  ;;  %v910_v42 = vsel %vm3147_vm0, %v3024_v15, %v764_v7  ;;  %v619_v56 = vsel %vm3205_vm4, %v2824_v16, %v475_v48  ;;  %vm890_vm12 = vcmp.ge.f32.partialorder %v3194_v45, 0.0  ;;  %s3570_s29 = sld [smem:[#allocation5 + %s4001_s23]] }
  0xd1   : > { %vm3245_vm14 = vmand %vm753_vm13, %vm755_vm1  ;;  %v1276_v46 = vstv %s3319_s4  ;;  %v1192_v4 = vstv %s3335_s17  ;;  %v1213_v20 = vstv %s3339_s10  ;;  %v1225_v10 = vstv %s3343_s15  ;;  %s4003_s17 = sadd.s32 21, %s2317_s28  ;;  %s3635_s15 = sld [smem:[#allocation5 + %s626_s9]] }
  0xd2   : > { %v3253_v17 = vsel %vm3245_vm14, %v3073_v0, %v613_v3  ;;  %v767_v15 = vsel %vm3245_vm14, 2, %v621_v44  ;;  %vm884_vm15 = vmand %vm880_vm11, %vm882_vm2  ;;  %v761_v16 = vsel %vm3245_vm14, %v2911_v50, %v615_v40  ;;  %v763_v14 = vsel %vm3245_vm14, %v2915_v51, %v617_v38  ;;  %s3591_s10 = sld [smem:[#allocation5 + %s4003_s17]]  ;;  %s1957_s28 = sshll.u32 %s4028_s25, 5 }
  0xd3   : > { %vm888_vm5 = vmand %vm884_vm15, %vm886_vm10  ;;  %vm901_vm8 = vcmp.lt.f32.partialorder %v3194_v45, %v3253_v17  ;;  %v765_v21 = vsel %vm3245_vm14, %v2939_v9, %v619_v56  ;;  %v1237_v62 = vstv %s3353_s8  ;;  %v1249_v7 = vstv %s3357_s12  ;;  %s3657_s9 = sld [smem:[#allocation5 + %s638_s30]] }
  0xd4   : > { %vm892_vm4 = vmand %vm888_vm5, %vm890_vm12  ;;  %v1255_v48 = vstv %s3361_s6  ;;  %vm1450_vm10 = vcmask 130048   ;;  %s4009_s25 = sld [smem:[#allocation35_spill]] }
  0xd5   : > { %vm899_vm11 = vmand %vm892_vm4, %vm897_vm6 }
  0xd6   : > { %vm3275_vm2 = vmand %vm899_vm11, %vm901_vm8 }
  0xd7   : > { %v913_v9 = vsel %vm3275_vm2, 3, %v767_v15  ;;  %1914 = vmatmul.msk.f32.vlgmr.msrb.gmra.mxu0 %vm929_vm3, %v1912_v29  ;;  %v3289_v13 = vsel %vm3275_vm2, %v2997_v11, %v761_v16  ;;  %v3294_v30 = vsel %vm3275_vm2, %v3004_v26, %v763_v14  ;;  %v3300_v33 = vsel %vm3275_vm2, %v3048_v25, %v765_v21 }
  0xd8   : > { %vm923_vm6 = vcmp.eq.s32.totalorder %v3103_v41, %v913_v9 }
  0xd9   : > { %v1902_v35 = vsel %vm923_vm6, 1.0, %v2191_v18 }
  0xda   : > { %1905 = vmatpush.msk.msra.mxu1 %vm933_vm7, %v1902_v35  ;;  %1910 = vmatpush.msk.msra.mxu3 %vm933_vm7, %v1902_v35  ;;  %s3744_s19 = scalar_lea.vmem %s4009_s25, %s1957_s28 }
  0xdb   : > { %1906 = vmatmul.msk.f32.vlgmr.msra.gmra.mxu1 %vm929_vm3, %v928_v32  ;;  %1911 = vmatmul.msk.f32.vlgmr.msra.gmra.mxu3 %vm929_vm3, %v1907_v36 }
  0xdc   : > { %1915 = vmatpush.msk.msrb.mxu1 %vm933_vm7, %v1902_v35 }
  0xe3   : > { %1916 = vmatmul.msk.f32.vlgmr.msrb.gmra.mxu1 %vm929_vm3, %v1912_v29 }
 0x14c   : > { %v957_v11 = vpop.f32.mrf.mxu0 }
 0x14d   : > { %v980_v25 = vmul.f32 %v957_v11, %v3175_v58 }
 0x152   : > { %v1004_v26 = vpop.f32.mrf.mxu2 }
 0x153   : > { %v1027_v34 = vmul.f32 %v1004_v26, %v3180_v12  ;;  %v1231_v12 = vstv %s3347_s18  ;;  %s3644_s18 = sld [smem:[#allocation5 + %s632_s13]] }
 0x154   : > { %v1053_v59 = vpop.f32.mrf.mxu0 }
 0x155   : > { %v1029_v0 = vadd.f32 %v1027_v34, %v980_v25  ;;  %v1076_v47 = vmul.f32 %v1053_v59, %v910_v42  ;;  %v3437_v34 = vadd.s32 8, %v3103_v41 }
 0x157   : > { %v3365_v27 = vadd.f32 %v1076_v47, %v1029_v0 }
 0x158   : > { %v977_v39 = vpop.f32.mrf.mxu1 }
 0x159   : > { %v1341_v61 = vadd.f32 1.0, %v3365_v27  ;;  %v1088_v23 = vrot.slane %v3365_v27, 1  ;;  %v1094_v5 = vrot.slane %v3365_v27, 2  ;;  %v1100_v55 = vmul.f32 %v3365_v27, %v3365_v27 }
 0x15a   : > { %v1110_v49 = vmul.f32 3.0, %v3365_v27  ;;  %v1196_v57 = vmul.f32 %v1195_v8, %v3365_v27  ;;  %v1202_v19 = vmul.f32 %v1201_v60, %v3365_v27  ;;  %v1214_v58 = vmul.f32 %v1213_v20, %v3365_v27 }
 0x15b   : > { %v1343_v31 = vmul.f32 16.0, %v1341_v61  ;;  %v3395_v32 = vmul.f32 %v1088_v23, %v3365_v27  ;;  %v1104_v53 = vrot.slane %v1100_v55, 1  ;;  %v3416_v40 = vmul.f32 %v1094_v5, %v3365_v27 }
 0x15c   : > { %v1112_v36 = vmul.f32 %v1110_v49, %v3365_v27  ;;  %v1198_v54 = vadd.f32 %v1196_v57, %v1192_v4  ;;  %v1206_v28 = vrot.slane %v1202_v19, 1  ;;  %v1218_v56 = vrot.slane %v1214_v58, 2 }
 0x15d   : > { %v1921_v1 = vadd.f32 -1.0, %v1343_v31  ;;  %v981_v44 = vmul.f32 %v977_v39, %v3289_v13  ;;  %v3422_v16 = vsub.f32 %v1100_v55, %v1104_v53  ;;  %v1226_v29 = vmul.f32 %v1225_v10, %v3395_v32 }
 0x15e   : > { %v1024_v3 = vpop.f32.mrf.mxu3  ;;  %v3418_v38 = vadd.f32 -1.0, %v1112_v36  ;;  %v1210_v42 = vadd.f32 %v1206_v28, %v1198_v54  ;;  %v1238_v9 = vmul.f32 %v1237_v62, %v3395_v32  ;;  %v1232_v0 = vmul.f32 %v1231_v12, %v3416_v40 }
 0x15f   : > { %v1028_v6 = vmul.f32 %v1024_v3, %v3294_v30  ;;  %v1347_v15 = vmul.f32 0.5, %v1921_v1  ;;  %v1250_v23 = vmul.f32 %v1249_v7, %v3422_v16  ;;  %v1120_v49 = vstv %s3406_s21 }
 0x160   : > { %v1073_v14 = vpop.f32.mrf.mxu1  ;;  %v1222_v21 = vadd.f32 %v1218_v56, %v1210_v42  ;;  %v1256_v35 = vmul.f32 %v3418_v38, %v1255_v48  ;;  %v1126_v58 = vstv %s3413_s14 }
 0x161   : > { %v1030_v11 = vadd.f32 %v1028_v6, %v981_v44  ;;  %v1077_v30 = vmul.f32 %v1073_v14, %v3300_v33  ;;  %v1349_v26 = vfloor.f32 %v1347_v15  ;;  %v1242_v33 = vrot.slane %v1238_v9, 1 }
 0x162   : > { %v1228_v59 = vadd.f32 %v1226_v29, %v1222_v21  ;;  %v1260_v55 = vrot.slane %v1256_v35, 2 }
 0x163   : > { %v3442_v47 = vadd.f32 %v1077_v30, %v1030_v11  ;;  %v3444_v39 = vsub.f32 %v1347_v15, %v1349_v26  ;;  %v1971_v61 = vcvt.f32.s32 %v1349_v26 }
 0x164   : > { %v1234_v5 = vadd.f32 %v1232_v0, %v1228_v59 }
 0x165   : > { %v1353_v57 = vsub.f32 1.0, %v3444_v39  ;;  %v1357_v19 = vadd.s32 1, %v1971_v61  ;;  %v1360_v31 = vperm.slane %v1971_v61, 0  ;;  %v1394_v53 = vperm.slane %v3444_v39, 0 }
 0x166   : > { %v1342_v36 = vadd.f32 1.0, %v3442_v47  ;;  %v1404_v54 = vperm.slane %v1971_v61, 1  ;;  %v1246_v28 = vadd.f32 %v1242_v33, %v1234_v5  ;;  %v1438_v0 = vperm.slane %v3444_v39, 1  ;;  %v3475_v39 = vld [vmem:[%s3997_s0] sm:$0xff] }
 0x167   : > { %vm1364_vm3 = vcmp.eq.s32.totalorder %v3437_v34, %v1360_v31  ;;  %v1374_v1 = vperm.slane %v1353_v57, 0  ;;  %v1380_v3 = vperm.slane %v1357_v19, 0  ;;  %vm1362_vm9 = vcmp.eq.s32.totalorder %v3103_v41, %v1360_v31 }
 0x168   : > { %v1925_v42 = vsel %vm1364_vm3, 1.0, %v2191_v18  ;;  %v1344_v56 = vmul.f32 16.0, %v1342_v36  ;;  %v1923_v44 = vsel %vm1362_vm9, 1.0, %v2191_v18  ;;  %vm1406_vm13 = vcmp.eq.s32.totalorder %v3103_v41, %v1404_v54 }
 0x169   : > { %v1378_v6 = vmul.f32 %v1925_v42, %v1374_v1  ;;  %vm1384_vm1 = vcmp.eq.s32.totalorder %v3437_v34, %v1380_v3  ;;  %v1376_v15 = vmul.f32 %v1923_v44, %v1374_v1  ;;  %vm1382_vm14 = vcmp.eq.s32.totalorder %v3103_v41, %v1380_v3 }
 0x16a   : > { %v1929_v14 = vsel %vm1384_vm1, 1.0, %v2191_v18  ;;  %v1922_v21 = vadd.f32 -1.0, %v1344_v56  ;;  %v1927_v29 = vsel %vm1382_vm14, 1.0, %v2191_v18  ;;  %v1931_v9 = vsel %vm1406_vm13, 1.0, %v2191_v18 }
 0x16b   : > { %v1398_v35 = vmul.f32 %v1929_v14, %v1394_v53  ;;  %v1396_v11 = vmul.f32 %v1927_v29, %v1394_v53  ;;  %v1418_v30 = vperm.slane %v1353_v57, 1  ;;  %v1424_v26 = vperm.slane %v1357_v19, 1 }
 0x16c   : > { %v1348_v59 = vmul.f32 0.5, %v1922_v21  ;;  %v1252_v61 = vadd.f32 %v1250_v23, %v1246_v28  ;;  %vm1408_vm12 = vcmp.eq.s32.totalorder %v3437_v34, %v1404_v54  ;;  %v3478_v23 = vld [vmem:[%s3997_s0 + $0x10] sm:$0xff]  ;;  %v1117_v1 = vstv %s3457_s3 }
 0x16d   : > { %v1402_v5 = vadd.f32 %v1398_v35, %v1378_v6  ;;  %v1400_v33 = vadd.f32 %v1396_v11, %v1376_v15  ;;  %v1420_v31 = vmul.f32 %v1931_v9, %v1418_v30  ;;  %vm1426_vm15 = vcmp.eq.s32.totalorder %v3103_v41, %v1424_v26 }
 0x16e   : > { %v1350_v36 = vfloor.f32 %v1348_v59  ;;  %v1935_v53 = vsel %vm1426_vm15, 1.0, %v2191_v18  ;;  %v3471_v57 = vadd.f32 %v1260_v55, %v1252_v61  ;;  %v1933_v19 = vsel %vm1408_vm12, 1.0, %v2191_v18 }
 0x16f   : > { %1471 = vmatpush.msrb.mxu2 %v1402_v5  ;;  %1544 = vmatpush.msra.mxu0 %v1402_v5  ;;  %v1440_v54 = vmul.f32 %v1935_v53, %v1438_v0  ;;  %v1422_v28 = vmul.f32 %v1933_v19, %v1418_v30  ;;  %vm1428_vm5 = vcmp.eq.s32.totalorder %v3437_v34, %v1424_v26  ;;  %v1089_v15 = vrot.slane %v3442_v47, 1 }
 0x170   : > { %v3482_v3 = vsub.f32 %v1348_v59, %v1350_v36  ;;  %v3484_v42 = vcvt.f32.s32 %v1350_v36  ;;  %v1937_v55 = vsel %vm1428_vm5, 1.0, %v2191_v18  ;;  %v3490_v56 = vmul.f32 %v1120_v49, %v3365_v27 }
 0x171   : > { %1472 = vmatpush.msrb.mxu2 %v1400_v33  ;;  %1545 = vmatpush.msra.mxu0 %v1400_v33  ;;  %v3492_v44 = vadd.f32 %v1440_v54, %v1420_v31  ;;  %v1442_v6 = vmul.f32 %v1937_v55, %v1438_v0  ;;  %v3498_v14 = vmul.f32 %v1126_v58, %v3365_v27  ;;  %v1095_v35 = vrot.slane %v3442_v47, 2 }
 0x172   : > { %v1354_v21 = vsub.f32 1.0, %v3482_v3  ;;  %v3502_v29 = vadd.s32 1, %v3484_v42  ;;  %v1361_v9 = vperm.slane %v3484_v42, 0  ;;  %1939 = vmatmul.msk.f32.vlgmr.msrb.gmra.mxu2 %vm1450_vm10, %v3475_v39  ;;  %1945 = vmatmul.msk.f32.vlgmr.msra.gmra.mxu0 %vm1450_vm10, %v3478_v23  ;;  %v1395_v11 = vperm.slane %v3482_v3, 0 }
 0x173   : > { %1617 = vmatpush.msra.mxu2 %v1402_v5  ;;  %v1405_v30 = vperm.slane %v3484_v42, 1  ;;  %v3512_v26 = vadd.f32 %v1442_v6, %v1422_v28  ;;  %v1111_v59 = vmul.f32 3.0, %v3442_v47  ;;  %v1439_v36 = vperm.slane %v3482_v3, 1  ;;  %v3535_v28 = vld [vmem:[%s3997_s0 + $0x8] sm:$0xff]  ;;  %v3538_v42 = vld [vmem:[%s3997_s0 + $0x18] sm:$0xff] }
 0x174   : > { %vm1365_vm8 = vcmp.eq.s32.totalorder %v3437_v34, %v1361_v9  ;;  %v1375_v0 = vperm.slane %v1354_v21, 0  ;;  %v1381_v61 = vperm.slane %v3502_v29, 0  ;;  %vm1363_vm4 = vcmp.eq.s32.totalorder %v3103_v41, %v1361_v9 }
 0x175   : > { %v1926_v5 = vsel %vm1365_vm8, 1.0, %v2191_v18  ;;  %1618 = vmatpush.msra.mxu2 %v1400_v33  ;;  %vm1407_vm11 = vcmp.eq.s32.totalorder %v3103_v41, %v1405_v30  ;;  %v1419_v31 = vperm.slane %v1354_v21, 1  ;;  %v1924_v19 = vsel %vm1363_vm4, 1.0, %v2191_v18 }
 0x176   : > { %v1379_v53 = vmul.f32 %v1926_v5, %v1375_v0  ;;  %vm1385_vm6 = vcmp.eq.s32.totalorder %v3437_v34, %v1381_v61  ;;  %vm1383_vm3 = vcmp.eq.s32.totalorder %v3103_v41, %v1381_v61  ;;  %v1932_v55 = vsel %vm1407_vm11, 1.0, %v2191_v18 }
 0x177   : > { %v1930_v54 = vsel %vm1385_vm6, 1.0, %v2191_v18  ;;  %v1928_v33 = vsel %vm1383_vm3, 1.0, %v2191_v18  ;;  %v1425_v6 = vperm.slane %v3502_v29, 1  ;;  %v1421_v61 = vmul.f32 %v1932_v55, %v1419_v31 }
 0x178   : > { %v1399_v21 = vmul.f32 %v1930_v54, %v1395_v11  ;;  %v1397_v9 = vmul.f32 %v1928_v33, %v1395_v11  ;;  %v1101_v5 = vmul.f32 %v3442_v47, %v3442_v47  ;;  %v1377_v51 = vmul.f32 %v1924_v19, %v1375_v0 }
 0x179   : > { %vm1427_vm9 = vcmp.eq.s32.totalorder %v3103_v41, %v1425_v6  ;;  %v1197_v37 = vmul.f32 %v1195_v8, %v3442_v47  ;;  %v1203_v25 = vmul.f32 %v1201_v60, %v3442_v47  ;;  %v1113_v11 = vmul.f32 %v1111_v59, %v3442_v47 }
 0x17a   : > { %v1403_v13 = vadd.f32 %v1399_v21, %v1379_v53  ;;  %1940 = vmatmul.msk.f32.gmra.mxu2 %vm1450_vm10, %v3535_v28  ;;  %1946 = vmatmul.msk.f32.gmra.mxu0 %vm1450_vm10, %v3538_v42  ;;  %v1936_v29 = vsel %vm1427_vm9, 1.0, %v2191_v18  ;;  %v1105_v41 = vrot.slane %v1101_v5, 1  ;;  %v3564_v60 = vmul.f32 %v1089_v15, %v3442_v47 }
 0x17b   : > { %v1441_v8 = vmul.f32 %v1936_v29, %v1439_v36  ;;  %v1199_v0 = vadd.f32 %v1197_v37, %v1192_v4  ;;  %v1207_v53 = vrot.slane %v1203_v25, 1  ;;  %v1401_v19 = vadd.f32 %v1397_v9, %v1377_v51 }
 0x17c   : > { %1494 = vmatpush.msrb.mxu3 %v1403_v13  ;;  %1567 = vmatpush.msra.mxu1 %v1403_v13  ;;  %v1215_v59 = vmul.f32 %v1213_v20, %v3442_v47  ;;  %v1123_v54 = vadd.f32 %v3490_v56, %v1117_v1  ;;  %v1138_v33 = vstv %s3520_s20  ;;  %v3586_v4 = vmul.f32 %v1095_v35, %v3442_v47 }
 0x17d   : > { %v3583_v37 = vadd.f32 %v1441_v8, %v1421_v61  ;;  %v1211_v25 = vadd.f32 %v1207_v53, %v1199_v0  ;;  %v1131_v51 = vrot.slane %v3498_v14, 1  ;;  %v3593_v20 = vsub.f32 %v1101_v5, %v1105_v41  ;;  %v3603_v14 = vld [vmem:[%s3997_s0 + $0x20] sm:$0xff] }
 0x17e   : > { %1495 = vmatpush.msrb.mxu3 %v1401_v19  ;;  %1568 = vmatpush.msra.mxu1 %v1401_v19  ;;  %v3595_v56 = vadd.f32 -1.0, %v1113_v11  ;;  %v1219_v15 = vrot.slane %v1215_v59, 2  ;;  %vm1409_vm13 = vcmp.eq.s32.totalorder %v3437_v34, %v1405_v30  ;;  %v1239_v35 = vmul.f32 %v1237_v62, %v3564_v60 }
 0x17f   : > { %1941 = vmatmul.msk.f32.vlgmr.msrb.gmra.mxu3 %vm1450_vm10, %v3475_v39  ;;  %1947 = vmatmul.msk.f32.vlgmr.msra.gmra.mxu1 %vm1450_vm10, %v3478_v23  ;;  %v1934_v55 = vsel %vm1409_vm13, 1.0, %v2191_v18  ;;  %vm1429_vm1 = vcmp.eq.s32.totalorder %v3437_v34, %v1425_v6  ;;  %v1150_v21 = vstv %s3530_s1  ;;  %v1227_v39 = vmul.f32 %v1225_v10, %v3564_v60 }
 0x180   : > { %1640 = vmatpush.msra.mxu3 %v1403_v13  ;;  %v1223_v30 = vadd.f32 %v1219_v15, %v1211_v25  ;;  %v1423_v23 = vmul.f32 %v1934_v55, %v1419_v31  ;;  %v1938_v9 = vsel %vm1429_vm1, 1.0, %v2191_v18  ;;  %v1233_v62 = vmul.f32 %v1231_v12, %v3586_v4 }
 0x181   : > { %v1443_v61 = vmul.f32 %v1938_v9, %v1439_v36  ;;  %v1135_v34 = vadd.f32 %v1131_v51, %v1123_v54  ;;  %v1139_v13 = vmul.f32 %v1138_v33, %v3365_v27  ;;  %v1251_v31 = vmul.f32 %v1249_v7, %v3593_v20 }
 0x182   : > { %1641 = vmatpush.msra.mxu3 %v1401_v19  ;;  %1951 = vmatmul.msk.f32.vlgmr.msra.gmra.mxu2 %vm1450_vm10, %v3603_v14  ;;  %v1229_v10 = vadd.f32 %v1227_v39, %v1223_v30  ;;  %v1257_v12 = vmul.f32 %v3595_v56, %v1255_v48  ;;  %v1162_v3 = vstv %s3559_s7  ;;  %v1243_v36 = vrot.slane %v1239_v35, 1 }
 0x183   : > { %v3630_v6 = vadd.f32 %v1443_v61, %v1423_v23  ;;  %v1143_v5 = vrot.slane %v1139_v13, 2  ;;  %v1156_v29 = vstv %s3570_s29  ;;  %v1163_v11 = vmul.f32 %v1162_v3, %v3395_v32 }
 0x184   : > { %v1235_v41 = vadd.f32 %v1233_v62, %v1229_v10  ;;  %v1180_v7 = vstv %s3581_s22  ;;  %v1122_v8 = vmul.f32 %v1120_v49, %v3442_v47  ;;  %v1151_v0 = vmul.f32 %v1150_v21, %v3395_v32  ;;  %v1950_v49 = vld [vmem:[%s3997_s0 + $0x28] sm:$0xff] }
 0x185   : > { %v1147_v48 = vadd.f32 %v1143_v5, %v1135_v34  ;;  %v1174_v53 = vstv %s3591_s10  ;;  %v1128_v19 = vmul.f32 %v1126_v58, %v3442_v47  ;;  %v1181_v54 = vmul.f32 %v3418_v38, %v1180_v7 }
 0x186   : > { %v1247_v59 = vadd.f32 %v1243_v36, %v1235_v41  ;;  %v1124_v25 = vadd.f32 %v1122_v8, %v1117_v1  ;;  %v1140_v51 = vmul.f32 %v1138_v33, %v3442_v47  ;;  %v1261_v15 = vrot.slane %v1257_v12, 2 }
 0x187   : > { %1942 = vmatmul.msk.f32.gmra.mxu3 %vm1450_vm10, %v3535_v28  ;;  %1948 = vmatmul.msk.f32.gmra.mxu1 %vm1450_vm10, %v3538_v42  ;;  %v1153_v58 = vadd.f32 %v1151_v0, %v1147_v48  ;;  %v1157_v35 = vmul.f32 %v1156_v29, %v3416_v40  ;;  %v1132_v55 = vrot.slane %v1128_v19, 1  ;;  %v1167_v1 = vrot.slane %v1163_v11, 1 }
 0x188   : > { %v1253_v30 = vadd.f32 %v1251_v31, %v1247_v59  ;;  %v1175_v33 = vmul.f32 %v1174_v53, %v3422_v16  ;;  %v1164_v39 = vmul.f32 %v1162_v3, %v3564_v60  ;;  %v1144_v42 = vrot.slane %v1140_v51, 2 }
 0x189   : > { %v1159_v28 = vadd.f32 %v1157_v35, %v1153_v58  ;;  %v1136_v23 = vadd.f32 %v1132_v55, %v1124_v25  ;;  %v1152_v9 = vmul.f32 %v1150_v21, %v3564_v60  ;;  %v1185_v61 = vrot.slane %v1181_v54, 2 }
 0x18a   : > { %1952 = vmatmul.msk.f32.gmra.mxu2 %vm1450_vm10, %v1950_v49  ;;  %v3669_v62 = vadd.f32 %v1261_v15, %v1253_v30  ;;  %v1158_v34 = vmul.f32 %v1156_v29, %v3586_v4  ;;  %v1271_v13 = vmul.f32 %v1270_v24, %v3365_v27  ;;  %v1182_v12 = vmul.f32 %v3595_v56, %v1180_v7 }
 0x18b   : > { %v1171_v10 = vadd.f32 %v1167_v1, %v1159_v28  ;;  %v1148_v31 = vadd.f32 %v1144_v42, %v1136_v23  ;;  %v1277_v21 = vmul.f32 %v1276_v46, %v3365_v27  ;;  %v1168_v3 = vrot.slane %v1164_v39, 1 }
 0x18c   : > { %v1273_v36 = vadd.f32 %v1271_v13, %v1267_v52  ;;  %v1289_v5 = vmul.f32 %v1288_v63, %v3365_v27  ;;  %v4004_v29 = vstv %s3375_s11  ;;  %v4005_v0 = vstv %s3383_s26 }
 0x18d   : > { %v1301_v41 = vmul.f32 %v4004_v29, %v3395_v32  ;;  %v1177_v11 = vadd.f32 %v1175_v33, %v1171_v10  ;;  %v1154_v8 = vadd.f32 %v1152_v9, %v1148_v31  ;;  %v1281_v48 = vrot.slane %v1277_v21, 1 }
 0x18e   : > { %v1307_v19 = vmul.f32 %v4005_v0, %v3416_v40  ;;  %v1293_v7 = vrot.slane %v1289_v5, 2  ;;  %v1312_v59 = vstv %s3635_s15  ;;  %v1324_v54 = vstv %s3644_s18 }
 0x18f   : > { %v1330_v25 = vstv %s3657_s9  ;;  %1953 = vmatmul.msk.f32.vlgmr.msra.gmra.mxu3 %vm1450_vm10, %v3603_v14  ;;  %v3695_v51 = vadd.f32 %v1185_v61, %v1177_v11  ;;  %v1160_v15 = vadd.f32 %v1158_v34, %v1154_v8  ;;  %v1285_v58 = vadd.f32 %v1281_v48, %v1273_v36 }
 0x190   : > { %v1313_v35 = vmul.f32 %v1312_v59, %v3395_v32  ;;  %v1325_v40 = vmul.f32 %v1324_v54, %v3422_v16  ;;  %v1176_v30 = vmul.f32 %v1174_v53, %v3593_v20  ;;  %v1186_v33 = vrot.slane %v1182_v12, 2 }
 0x191   : > { %v1172_v55 = vadd.f32 %v1168_v3, %v1160_v15  ;;  %v1297_v1 = vadd.f32 %v1293_v7, %v1285_v58  ;;  %v1331_v39 = vmul.f32 %v3418_v38, %v1330_v25  ;;  %v1272_v14 = vmul.f32 %v1270_v24, %v3442_v47 }
 0x192   : > { %v1317_v42 = vrot.slane %v1313_v35, 1  ;;  %v1278_v9 = vmul.f32 %v1276_v46, %v3442_v47  ;;  %v1290_v16 = vmul.f32 %v1288_v63, %v3442_v47  ;;  %v4006_v53 = vmov %v4004_v29 }
 0x193   : > { %v1178_v28 = vadd.f32 %v1176_v30, %v1172_v55  ;;  %v1303_v23 = vadd.f32 %v1301_v41, %v1297_v1  ;;  %v1274_v32 = vadd.f32 %v1272_v14, %v1267_v52  ;;  %v1302_v61 = vmul.f32 %v4006_v53, %v3564_v60 }
 0x194   : > { %v4007_v34 = vmov %v4005_v0  ;;  %v1282_v10 = vrot.slane %v1278_v9, 1  ;;  %v1314_v31 = vmul.f32 %v1312_v59, %v3564_v60  ;;  %v1326_v46 = vmul.f32 %v1324_v54, %v3593_v20 }
 0x195   : > { %v1308_v38 = vmul.f32 %v4007_v34, %v3586_v4  ;;  %v3718_v13 = vadd.f32 %v1186_v33, %v1178_v28  ;;  %v1309_v24 = vadd.f32 %v1307_v19, %v1303_v23  ;;  %v1294_v63 = vrot.slane %v1290_v16, 2 }
 0x196   : > { %v1286_v12 = vadd.f32 %v1282_v10, %v1274_v32  ;;  %v1335_v3 = vrot.slane %v1331_v39, 2  ;;  %v4008_v4 = vsel %vm3147_vm0, %v3065_v43, %v3117_v22  ;;  %vm1719_vm12 = vcmask 1040384  }
 0x197   : > { %1954 = vmatmul.msk.f32.gmra.mxu3 %vm1450_vm10, %v1950_v49  ;;  %v1321_v52 = vadd.f32 %v1317_v42, %v1309_v24  ;;  %vm914_vm14 = vcmp.lt.f32.partialorder %v4008_v4, inf  ;;  %vm1080_vm15 = vcmp.lt.f32.partialorder %v3365_v27, -0.05  ;;  %vm1722_vm5 = vcmask 1041408  }
 0x198   : > { %v1298_v36 = vadd.f32 %v1294_v63, %v1286_v12  ;;  %v1318_v49 = vrot.slane %v1314_v31, 1  ;;  %v1332_v41 = vmul.f32 %v3595_v56, %v1330_v25  ;;  %v3735_v2 = vsel %vm914_vm14, 1.0, %v2191_v18 }
 0x199   : > { %v1327_v21 = vadd.f32 %v1325_v40, %v1321_v52  ;;  %vm1725_vm10 = vcmask 1042432   ;;  %v1917_v43 = vsel %vm1080_vm15, 1.0, %v2191_v18  ;;  %v1715_v22 = vrot.slane %v3365_v27, 5 }
 0x19a   : > { %v1304_v29 = vadd.f32 %v1302_v61, %v1298_v36  ;;  %v1336_v19 = vrot.slane %v1332_v41, 2  ;;  %v4010_v27 = vsel %vm3275_vm2, %v3194_v45, %v3253_v17  ;;  %vm1081_vm8 = vcmp.lt.f32.partialorder %v3442_v47, -0.05 }
 0x19b   : > { %v3728_v5 = vadd.f32 %v1335_v3, %v1327_v21  ;;  %vm915_vm0 = vcmp.lt.f32.partialorder %v4010_v27, inf  ;;  %v1918_v15 = vsel %vm1081_vm8, 1.0, %v2191_v18  ;;  %v1716_v58 = vrot.slane %v3442_v47, 5 }
 0x19c   : > { %v1310_v20 = vadd.f32 %v1308_v38, %v1304_v29  ;;  %v3760_v25 = vsel %vm915_vm0, 1.0, %v2191_v18  ;;  %vm1730_vm2 = vcmask 1044480   ;;  %vm1733_vm4 = vcmask 1045504  }
 0x19d   : > { %v1711_v60 = vrot.slane %v3728_v5, 3  ;;  %vm1736_vm11 = vcmask 1046528  }
 0x19e   : > { %v1322_v8 = vadd.f32 %v1318_v49, %v1310_v20 }
 0x19f   : > { %v1739_v11 = vsel %vm1719_vm12, %v1711_v60, %v3735_v2 }
 0x1a0   : > { %v1741_v56 = vsel %vm1722_vm5, %v1739_v11, %v1917_v43  ;;  %v1328_v0 = vadd.f32 %v1326_v46, %v1322_v8 }
 0x1a1   : > { %v1743_v48 = vsel %vm1725_vm10, %v1741_v56, %v1715_v22 }
 0x1a2   : > { %v1745_v7 = vsel %vm933_vm7, %v1743_v48, %v1715_v22  ;;  %v3755_v59 = vadd.f32 %v1336_v19, %v1328_v0 }
 0x1a3   : > { %1749 = vst [vmem:[%s3744_s19 + $0x10] sm:$0x1f] %v1745_v7 }
 0x1a4   : > { %v1712_v54 = vrot.slane %v3755_v59, 3 }
 0x1a6   : > { %v1740_v50 = vsel %vm1719_vm12, %v1712_v54, %v3760_v25 }
 0x1a7   : > { %v1742_v45 = vsel %vm1722_vm5, %v1740_v50, %v1918_v15 }
 0x1a8   : > { %v1744_v17 = vsel %vm1725_vm10, %v1742_v45, %v1716_v58 }
 0x1a9   : > { %v1746_v35 = vsel %vm933_vm7, %v1744_v17, %v1716_v58 }
 0x1aa   : > { %1750 = vst [vmem:[%s3744_s19 + $0x18] sm:$0x1f] %v1746_v35 }
 0x1ef   : > { %v1547_v40 = vpop.f32.mrf.mxu0 }
 0x1f0   : > { %v1576_v1 = vmul.f32 %v1547_v40, %v3492_v44 }
 0x1f5   : > { %v1474_v55 = vpop.f32.mrf.mxu2 }
 0x1f6   : > { %v1503_v28 = vmul.f32 %v1474_v55, %v3492_v44 }
 0x1f7   : > { %v1550_v30 = vpop.f32.mrf.mxu0 }
 0x1f8   : > { %v1578_v33 = vmul.f32 %v1550_v30, %v3512_v26 }
 0x1fa   : > { %v1580_v18 = vadd.f32 %v1578_v33, %v1576_v1 }
 0x1fc   : > { %v1570_v39 = vpop.f32.mrf.mxu1  ;;  %v1581_v47 = vrot.slane %v1580_v18, 4 }
 0x1fd   : > { %v1477_v14 = vpop.f32.mrf.mxu2  ;;  %v1577_v10 = vmul.f32 %v1570_v39, %v3583_v37 }
 0x1fe   : > { %v1582_v23 = vadd.f32 %v1581_v47, %v1580_v18  ;;  %v1505_v42 = vmul.f32 %v1477_v14, %v3512_v26 }
 0x200   : > { %v1583_v9 = vrot.slane %v1582_v23, 2  ;;  %v1507_v32 = vadd.f32 %v1505_v42, %v1503_v28 }
 0x202   : > { %v1497_v16 = vpop.f32.mrf.mxu3  ;;  %v1584_v53 = vadd.f32 %v1583_v9, %v1582_v23  ;;  %v1508_v61 = vrot.slane %v1507_v32, 4 }
 0x203   : > { %v1504_v60 = vmul.f32 %v1497_v16, %v3583_v37 }
 0x204   : > { %v1585_v34 = vrot.slane %v1584_v53, 1  ;;  %v1573_v38 = vpop.f32.mrf.mxu1  ;;  %v1509_v24 = vadd.f32 %v1508_v61, %v1507_v32 }
 0x205   : > { %v1579_v31 = vmul.f32 %v1573_v38, %v3630_v6  ;;  %v1620_v46 = vpop.f32.mrf.mxu2 }
 0x206   : > { %v3776_v52 = vadd.f32 %v1585_v34, %v1584_v53  ;;  %v1510_v12 = vrot.slane %v1509_v24, 2  ;;  %v1649_v48 = vmul.f32 %v1620_v46, %v3492_v44 }
 0x207   : > { %v1587_v63 = vadd.f32 %v1579_v31, %v1577_v10 }
 0x208   : > { %v1671_v21 = vmul.f32 %v3776_v52, %v3471_v57  ;;  %v1511_v3 = vadd.f32 %v1510_v12, %v1509_v24 }
 0x209   : > { %v1588_v36 = vrot.slane %v1587_v63, 4 }
 0x20a   : > { %v1512_v4 = vrot.slane %v1511_v3, 1  ;;  %v1500_v29 = vpop.f32.mrf.mxu3  ;;  %v1673_v8 = vmul.f32 %v3735_v2, %v1671_v21 }
 0x20b   : > { %v1589_v20 = vadd.f32 %v1588_v36, %v1587_v63  ;;  %v1506_v49 = vmul.f32 %v1500_v29, %v3630_v6 }
 0x20c   : > { %v1513_v41 = vadd.f32 %v1512_v4, %v1511_v3  ;;  %v1687_v50 = vrot.slane %v1673_v8, 2  ;;  %v1706_v8 = vrot.slane %v3669_v62, 4 }
 0x20d   : > { %v1590_v43 = vrot.slane %v1589_v20, 2  ;;  %v1514_v22 = vadd.f32 %v1506_v49, %v1504_v60  ;;  %v1623_v11 = vpop.f32.mrf.mxu2 }
 0x20e   : > { %v1667_v56 = vmul.f32 %v1513_v41, %v3695_v51  ;;  %v1651_v0 = vmul.f32 %v1623_v11, %v3512_v26 }
 0x20f   : > { %v1591_v19 = vadd.f32 %v1590_v43, %v1589_v20  ;;  %v1515_v7 = vrot.slane %v1514_v22, 4 }
 0x210   : > { %v1669_v27 = vmul.f32 %v3735_v2, %v1667_v56  ;;  %v1653_v54 = vadd.f32 %v1651_v0, %v1649_v48 }
 0x211   : > { %v1592_v15 = vrot.slane %v1591_v19, 1  ;;  %v1516_v58 = vadd.f32 %v1515_v7, %v1514_v22 }
 0x212   : > { %v1681_v45 = vrot.slane %v1669_v27, 3  ;;  %v1643_v17 = vpop.f32.mrf.mxu3  ;;  %v1654_v35 = vrot.slane %v1653_v54, 4 }
 0x213   : > { %v1593_v40 = vadd.f32 %v1592_v15, %v1591_v19  ;;  %v1517_v55 = vrot.slane %v1516_v58, 2  ;;  %v1650_v9 = vmul.f32 %v1643_v17, %v3583_v37 }
 0x214   : > { %v1720_v30 = vsel %vm1719_vm12, %v1681_v45, %v1687_v50  ;;  %v1655_v1 = vadd.f32 %v1654_v35, %v1653_v54 }
 0x215   : > { %v1672_v44 = vmul.f32 %v1593_v40, %v3669_v62  ;;  %v1518_v33 = vadd.f32 %v1517_v55, %v1516_v58 }
 0x216   : > { %v1656_v26 = vrot.slane %v1655_v1, 2 }
 0x217   : > { %v1519_v18 = vrot.slane %v1518_v33, 1  ;;  %v1674_v23 = vmul.f32 %v3760_v25, %v1672_v44 }
 0x218   : > { %v1657_v39 = vadd.f32 %v1656_v26, %v1655_v1 }
 0x219   : > { %v1520_v47 = vadd.f32 %v1519_v18, %v1518_v33  ;;  %v1688_v38 = vrot.slane %v1674_v23, 2 }
 0x21a   : > { %v1658_v14 = vrot.slane %v1657_v39, 1  ;;  %v1646_v28 = vpop.f32.mrf.mxu3 }
 0x21b   : > { %v1668_v42 = vmul.f32 %v1520_v47, %v3718_v13  ;;  %v1652_v32 = vmul.f32 %v1646_v28, %v3630_v6 }
 0x21c   : > { %v1659_v16 = vadd.f32 %v1658_v14, %v1657_v39 }
 0x21d   : > { %v1670_v53 = vmul.f32 %v3760_v25, %v1668_v42  ;;  %v1660_v61 = vadd.f32 %v1652_v32, %v1650_v9 }
 0x21e   : > { %v1675_v34 = vmul.f32 %v1659_v16, %v3728_v5  ;;  %v1699_v5 = vrot.slane %v3695_v51, 5 }
 0x21f   : > { %v1682_v24 = vrot.slane %v1670_v53, 3  ;;  %v1661_v10 = vrot.slane %v1660_v61, 4 }
 0x220   : > { %v1677_v31 = vmul.f32 %v3735_v2, %v1675_v34  ;;  %v1705_v2 = vrot.slane %v3471_v57, 4  ;;  %v1700_v57 = vrot.slane %v3718_v13, 5 }
 0x221   : > { %v1721_v46 = vsel %vm1719_vm12, %v1682_v24, %v1688_v38  ;;  %v1662_v12 = vadd.f32 %v1661_v10, %v1660_v61 }
 0x222   : > { %v1693_v63 = vrot.slane %v1677_v31, 1 }
 0x223   : > { %v1663_v21 = vrot.slane %v1662_v12, 2 }
 0x224   : > { %v1723_v37 = vsel %vm1722_vm5, %v1720_v30, %v1693_v63 }
 0x225   : > { %v1726_v6 = vsel %vm1725_vm10, %v1723_v37, %v1513_v41  ;;  %v1664_v3 = vadd.f32 %v1663_v21, %v1662_v12 }
 0x226   : > { %v1728_v36 = vsel %vm933_vm7, %v1726_v6, %v3776_v52 }
 0x227   : > { %v1731_v4 = vsel %vm1730_vm2, %v1728_v36, %v1659_v16  ;;  %v1665_v29 = vrot.slane %v1664_v3, 1 }
 0x228   : > { %v1734_v60 = vsel %vm1733_vm4, %v1731_v4, %v1699_v5 }
 0x229   : > { %v1737_v20 = vsel %vm1736_vm11, %v1734_v60, %v1705_v2  ;;  %v1666_v49 = vadd.f32 %v1665_v29, %v1664_v3 }
 0x22a   : > { %1747 = vst [vmem:[%s3744_s19] sm:$0xff] %v1737_v20 }
 0x22b   : > { %v1676_v41 = vmul.f32 %v1666_v49, %v3755_v59 }
 0x22d   : > { %v1678_v51 = vmul.f32 %v3760_v25, %v1676_v41 }
 0x22f   : > { %v1694_v43 = vrot.slane %v1678_v51, 1 }
 0x231   : > { %v1724_v52 = vsel %vm1722_vm5, %v1721_v46, %v1694_v43 }
 0x232   : > { %v1727_v22 = vsel %vm1725_vm10, %v1724_v52, %v1520_v47 }
 0x233   : > { %v1729_v11 = vsel %vm933_vm7, %v1727_v22, %v1593_v40 }
 0x234   : > { %v1732_v56 = vsel %vm1730_vm2, %v1729_v11, %v1666_v49 }
 0x235   : > { %v1735_v48 = vsel %vm1733_vm4, %v1732_v56, %v1700_v57 }
 0x236   : > { %v1738_v0 = vsel %vm1736_vm11, %v1735_v48, %v1706_v8 }
 0x237   : > { %1748 = vst [vmem:[%s3744_s19 + $0x8] sm:$0xff] %v1738_v0 }
 0x238 PF: > { %s4011_s5 = sld [smem:[#allocation15_spill]] }
 0x239   : > { %s4012_s15 = sld [smem:[#allocation11_spill]] }
 0x23a   : > { %s4013_s16 = sld [smem:[#allocation12_spill]] }
 0x23b   : > { %s4014_s17 = sld [smem:[#allocation17_spill]] }
 0x23c   : > { %s4015_s18 = sld [smem:[#allocation14_spill]] }
 0x23d   : > { %s4016_s19 = sld [smem:[#allocation16_spill]] }
 0x23e   : > { %s19_s20 = sadd.s32 1, %s4011_s5  }
 0x23f   : > { %p16_p10 = scmp.ge.s32.totalorder %s19_s20, 4  }
 0x241   :  { %18 = sbr.rel (!%p16_p10) target bundleno = 12 (0xc), region = 92 }
 0x246   :  { %1781 = vsyncpa [#allocation3], 1 }
 0x247   :  { %1783 = vsyncpa [#allocation3 + $0x1], 1 }
 0x248   :  { %1784 = vsyncpa [#allocation4], 1 }
 0x249   :  { %1786 = vsyncpa [#allocation4 + $0x1], 1 }
 0x24a   :  { %1787 = vsyncpa [#allocation6], 1 }

</bundles_post_ra>
